<compile_context>
chip_gen: v5e
topology: v5e:2x2
jax: 0.10.0
libtpu: 0.0.40
codegen_flags: <defaults>
</compile_context>

<pallas_src>
import functools
import math

import jax
import jax.numpy as jnp
from jax.experimental import pallas as pl
from jax.experimental.pallas import tpu as pltpu

# ----------------------------- config (small, synthetic) -----------------------------
VOCAB = 100
MAX_POS = 40
TYPE_VOCAB = 1
HIDDEN = 32
INTERMEDIATE = 64
NUM_LAYERS = 2
NUM_HEADS = 2
HEAD_DIM = HIDDEN // NUM_HEADS
NUM_LABELS = 3
LN_EPS = 1e-5
PAD_ID = 1                    # XLM-R padding_idx
LOGIT_LANES = 128             # lane-dense logits slab; sliced to NUM_LABELS in JAX
MATMUL_DTYPE = jnp.bfloat16   # matmul operands only; LN/softmax/residual math stays f32


# ----------------------------- in-kernel helpers -----------------------------
def _layernorm(x, g, b, eps):
    mean = jnp.mean(x, axis=-1, keepdims=True)
    var = jnp.mean(jnp.square(x - mean), axis=-1, keepdims=True)
    return (x - mean) * jax.lax.rsqrt(var + eps) * g + b


# ----------------------------- fully fused model kernel -----------------------------
def _model_kernel(h0_ref, embg_ref, embb_ref, mask_ref,
                  wqkv_ref, bqkv_ref, wo_ref, bo_ref, ln1g_ref, ln1b_ref,
                  wi_ref, bi_ref, wf_ref, bf_ref, ln2g_ref, ln2b_ref,
                  pw_ref, pb_ref, cw_ref, cb_ref,
                  logits_ref, *, B, S, nH, Dh, L, eps):
    H = nH * Dh
    BS = B * S

    # Embedding LayerNorm; activation stays a live value in VMEM/vregs for the whole kernel.
    x = _layernorm(h0_ref[...], embg_ref[...], embb_ref[...], eps)          # [BS, H] f32

    # Hoist the additive-mask broadcast out of the layer/head loops (no CSE in JAX).
    mask_b = jnp.broadcast_to(mask_ref[...], (B, S, S))                     # [B, S, S]

    for l in range(L):                      # static layer loop, whole encoder in one body
        # ---- self-attention: fused QKV matmul (Wq/bq pre-scaled by 1/sqrt(Dh)) ----
        qkv = jnp.dot(x.astype(MATMUL_DTYPE), wqkv_ref[l],
                      preferred_element_type=jnp.float32) + bqkv_ref[l]     # [BS, 3H] f32
        q = qkv[:, 0 * H:1 * H].reshape(B, S, H)
        k = qkv[:, 1 * H:2 * H].reshape(B, S, H)
        v = qkv[:, 2 * H:3 * H].reshape(B, S, H)

        ctx_heads = []
        for h in range(nH):                 # tiny static head loop
            sl = slice(h * Dh, (h + 1) * Dh)
            s = jnp.einsum("bqd,bkd->bqk", q[:, :, sl], k[:, :, sl],
                           preferred_element_type=jnp.float32) + mask_b     # [B, S, S]
            s = s - jnp.max(s, axis=-1, keepdims=True)
            p = jnp.exp(s)
            p = p * pl.reciprocal(jnp.sum(p, axis=-1, keepdims=True), approx=True)
            ctx_heads.append(jnp.einsum("bqk,bkd->bqd", p, v[:, :, sl],
                                        preferred_element_type=jnp.float32))
        ctx = jnp.concatenate(ctx_heads, axis=-1).reshape(BS, H)            # [BS, H]

        # Single fused output projection (one MXU push instead of nH accumulated dots).
        attn = jnp.dot(ctx.astype(MATMUL_DTYPE), wo_ref[l],
                       preferred_element_type=jnp.float32) + bo_ref[l]
        h1 = _layernorm(attn + x, ln1g_ref[l], ln1b_ref[l], eps)            # residual + LN

        # ---- feed-forward ----
        inter = jnp.dot(h1.astype(MATMUL_DTYPE), wi_ref[l],
                        preferred_element_type=jnp.float32) + bi_ref[l]
        inter = jax.nn.gelu(inter, approximate=True)
        ffn = jnp.dot(inter.astype(MATMUL_DTYPE), wf_ref[l],
                      preferred_element_type=jnp.float32) + bf_ref[l]
        x = _layernorm(ffn + h1, ln2g_ref[l], ln2b_ref[l], eps)

    # ---- pooler (CLS token: row b*S) + classifier, fused into the same kernel ----
    x_cls = x.reshape(B, S, H)[:, 0, :]                                     # [B, H]
    pooled = jnp.tanh(jnp.dot(x_cls.astype(MATMUL_DTYPE), pw_ref[...],
                              preferred_element_type=jnp.float32) + pb_ref[...])
    # Dropout (eval mode) == identity.
    logits_ref[...] = (jnp.dot(pooled.astype(MATMUL_DTYPE), cw_ref[...],
                               preferred_element_type=jnp.float32)
                       + cb_ref[...]).astype(logits_ref.dtype)              # [B, 128]


# gridless index maps (plain defs, zero grid args)
def _c2():
    return (0, 0)


def _c3():
    return (0, 0, 0)


def fused_forward(h0, emb_g, emb_b, ext_mask, enc, pw, pb, cw, cb):
    BS, H = h0.shape
    B, _, S = ext_mask.shape
    L = enc["wqkv"].shape[0]
    I = enc["wi"].shape[2]
    LANES = cw.shape[1]

    kernel = functools.partial(_model_kernel, B=B, S=S, nH=NUM_HEADS,
                               Dh=HEAD_DIM, L=L, eps=LN_EPS)

    args = (h0, emb_g, emb_b, ext_mask,
            enc["wqkv"], enc["bqkv"], enc["wo"], enc["bo"], enc["ln1g"], enc["ln1b"],
            enc["wi"], enc["bi"], enc["wf"], enc["bf"], enc["ln2g"], enc["ln2b"],
            pw, pb, cw, cb)

    in_specs = [pl.BlockSpec(a.shape, _c2 if a.ndim == 2 else _c3) for a in args]

    # Advisory cost hint for XLA scheduling around the custom call.
    flops = int(L * (2 * BS * H * 3 * H + 2 * BS * H * H
                     + 2 * BS * H * I + 2 * BS * I * H
                     + 4 * B * S * S * H)
                + 2 * B * H * H + 2 * B * H * LANES)
    transcendentals = int(L * (BS * I + B * NUM_HEADS * S * S) + B * H)
    bytes_accessed = int(sum(a.size * a.dtype.itemsize for a in args) + B * LANES * 4)

    return pl.pallas_call(
        kernel,
        out_shape=jax.ShapeDtypeStruct((B, LANES), jnp.float32),
        in_specs=in_specs,
        out_specs=pl.BlockSpec((B, LANES), _c2),
        compiler_params=pltpu.CompilerParams(vmem_limit_bytes=32 * 1024 * 1024),
        cost_estimate=pl.CostEstimate(flops=flops, transcendentals=transcendentals,
                                      bytes_accessed=bytes_accessed),
    )(*args)


# ----------------------------- parameters -----------------------------
def init_params(key):
    keys = iter(jax.random.split(key, 256))

    def w(shape, scale=0.02):
        return jax.random.normal(next(keys), shape, jnp.float32) * scale

    def ln():
        return jnp.ones((HIDDEN,), jnp.float32), jnp.zeros((HIDDEN,), jnp.float32)

    layers = []
    for _ in range(NUM_LAYERS):
        g1, b1 = ln()
        g2, b2 = ln()
        layers.append(dict(
            wq=w((HIDDEN, HIDDEN)), bq=jnp.zeros((HIDDEN,), jnp.float32),
            wk=w((HIDDEN, HIDDEN)), bk=jnp.zeros((HIDDEN,), jnp.float32),
            wv=w((HIDDEN, HIDDEN)), bv=jnp.zeros((HIDDEN,), jnp.float32),
            wo=w((HIDDEN, HIDDEN)), bo=jnp.zeros((HIDDEN,), jnp.float32),
            attn_ln_g=g1, attn_ln_b=b1,
            wi=w((HIDDEN, INTERMEDIATE)), bi=jnp.zeros((INTERMEDIATE,), jnp.float32),
            wf=w((INTERMEDIATE, HIDDEN)), bf=jnp.zeros((HIDDEN,), jnp.float32),
            ffn_ln_g=g2, ffn_ln_b=b2,
        ))

    emb_g, emb_b = ln()
    return dict(
        word_emb=w((VOCAB, HIDDEN)),
        pos_emb=w((MAX_POS, HIDDEN)),
        type_emb=w((TYPE_VOCAB, HIDDEN)),
        emb_ln_g=emb_g, emb_ln_b=emb_b,
        layers=layers,
        pool_w=w((HIDDEN, HIDDEN)), pool_b=jnp.zeros((HIDDEN,), jnp.float32),
        cls_w=w((HIDDEN, NUM_LABELS)), cls_b=jnp.zeros((NUM_LABELS,), jnp.float32),
    )


def prepare_encoder_weights(params):
    """Stack per-layer weights into [L, ...]; fuse Q|K|V, fold 1/sqrt(Dh) into Wq/bq,
    store matmul weights in bf16 (biases / LN params stay f32)."""
    scale = 1.0 / math.sqrt(HEAD_DIM)
    cols = {k: [] for k in ("wqkv", "bqkv", "wo", "bo", "ln1g", "ln1b",
                            "wi", "bi", "wf", "bf", "ln2g", "ln2b")}
    for lyr in params["layers"]:
        cols["wqkv"].append(jnp.concatenate(
            [lyr["wq"] * scale, lyr["wk"], lyr["wv"]], axis=1).astype(MATMUL_DTYPE))
        cols["bqkv"].append(jnp.concatenate([lyr["bq"] * scale, lyr["bk"], lyr["bv"]])[None, :])
        cols["wo"].append(lyr["wo"].astype(MATMUL_DTYPE))
        cols["bo"].append(lyr["bo"][None, :])
        cols["ln1g"].append(lyr["attn_ln_g"][None, :])
        cols["ln1b"].append(lyr["attn_ln_b"][None, :])
        cols["wi"].append(lyr["wi"].astype(MATMUL_DTYPE))
        cols["bi"].append(lyr["bi"][None, :])
        cols["wf"].append(lyr["wf"].astype(MATMUL_DTYPE))
        cols["bf"].append(lyr["bf"][None, :])
        cols["ln2g"].append(lyr["ffn_ln_g"][None, :])
        cols["ln2b"].append(lyr["ffn_ln_b"][None, :])
    return {k: jnp.stack(v, axis=0) for k, v in cols.items()}


def prepare_head_weights(params):
    """Pooler + classifier weights; classifier padded to a 128-lane slab (lane-dense store)."""
    H = HIDDEN
    pw = params["pool_w"].astype(MATMUL_DTYPE)
    pb = params["pool_b"].reshape(1, H)
    cw = jnp.zeros((H, LOGIT_LANES), jnp.float32).at[:, :NUM_LABELS].set(
        params["cls_w"]).astype(MATMUL_DTYPE)
    cb = jnp.zeros((1, LOGIT_LANES), jnp.float32).at[:, :NUM_LABELS].set(
        params["cls_b"][None, :])
    return dict(pw=pw, pb=pb, cw=cw, cb=cb)


# ----------------------------- forward pass -----------------------------
def model_forward(params, enc, head, input_ids, attention_mask):
    B, S = input_ids.shape
    H = HIDDEN

    # RoBERTa-style position ids: cumsum over non-pad tokens, offset by padding_idx.
    not_pad = (input_ids != PAD_ID).astype(jnp.int32)
    position_ids = jnp.cumsum(not_pad, axis=1) * not_pad + PAD_ID
    token_type_ids = jnp.zeros((B, S), jnp.int32)

    # Embedding table gathers stay in plain JAX (no small-gather Pallas win here).
    emb = (params["word_emb"][input_ids]
           + params["pos_emb"][position_ids]
           + params["type_emb"][token_type_ids])
    h0 = emb.reshape(B * S, H)

    ext_mask = ((1.0 - attention_mask.astype(jnp.float32)) * -10000.0)[:, None, :]  # [B,1,S]

    logits_pad = fused_forward(h0,
                               params["emb_ln_g"].reshape(1, H),
                               params["emb_ln_b"].reshape(1, H),
                               ext_mask, enc,
                               head["pw"], head["pb"], head["cw"], head["cb"])
    return logits_pad[:, :NUM_LABELS]


# ----------------------------- driver -----------------------------
if __name__ == "__main__":
    key = jax.random.PRNGKey(0)
    pkey, dkey = jax.random.split(key)
    params = init_params(pkey)
    enc = prepare_encoder_weights(params)
    head = prepare_head_weights(params)

    B, S = 2, 8
    input_ids = jax.random.randint(dkey, (B, S), 2, VOCAB, dtype=jnp.int32)
    # make the last two tokens of the second sequence padding to exercise the mask
    input_ids = input_ids.at[1, -2:].set(PAD_ID)
    attention_mask = (input_ids != PAD_ID).astype(jnp.int32)

    logits = jax.jit(model_forward)(params, enc, head, input_ids, attention_mask)
    logits = jax.block_until_ready(logits)
    assert logits.shape == (B, NUM_LABELS)
    assert bool(jnp.all(jnp.isfinite(logits)))
    print("KERNEL_OK")
</pallas_src>

<mosaic_0001>
module attributes {stable_mosaic.version = 11 : i64} {
  func.func @_model_kernel(%arg0: memref<16x32xf32, #tpu.memory_space<vmem>>, %arg1: memref<1x32xf32, #tpu.memory_space<vmem>>, %arg2: memref<1x32xf32, #tpu.memory_space<vmem>>, %arg3: memref<2x1x8xf32, #tpu.memory_space<vmem>>, %arg4: memref<2x32x96xbf16, #tpu.memory_space<vmem>>, %arg5: memref<2x1x96xf32, #tpu.memory_space<vmem>>, %arg6: memref<2x32x32xbf16, #tpu.memory_space<vmem>>, %arg7: memref<2x1x32xf32, #tpu.memory_space<vmem>>, %arg8: memref<2x1x32xf32, #tpu.memory_space<vmem>>, %arg9: memref<2x1x32xf32, #tpu.memory_space<vmem>>, %arg10: memref<2x32x64xbf16, #tpu.memory_space<vmem>>, %arg11: memref<2x1x64xf32, #tpu.memory_space<vmem>>, %arg12: memref<2x64x32xbf16, #tpu.memory_space<vmem>>, %arg13: memref<2x1x32xf32, #tpu.memory_space<vmem>>, %arg14: memref<2x1x32xf32, #tpu.memory_space<vmem>>, %arg15: memref<2x1x32xf32, #tpu.memory_space<vmem>>, %arg16: memref<32x32xbf16, #tpu.memory_space<vmem>>, %arg17: memref<1x32xf32, #tpu.memory_space<vmem>>, %arg18: memref<32x128xbf16, #tpu.memory_space<vmem>>, %arg19: memref<1x128xf32, #tpu.memory_space<vmem>>, %arg20: memref<2x128xf32, #tpu.memory_space<vmem>>) attributes {dimension_semantics = [], scalar_prefetch = 0 : i64, scratch_operands = 0 : i64, tpu.core_type = #tpu.core_type<tc>} {
    %c0 = arith.constant 0 : index
    %c0_0 = arith.constant 0 : index
    %0 = vector.load %arg0[%c0, %c0_0] : memref<16x32xf32, #tpu.memory_space<vmem>>, vector<16x32xf32>
    %c0_1 = arith.constant 0 : index
    %c0_2 = arith.constant 0 : index
    %1 = vector.load %arg1[%c0_1, %c0_2] : memref<1x32xf32, #tpu.memory_space<vmem>>, vector<1x32xf32>
    %c0_3 = arith.constant 0 : index
    %c0_4 = arith.constant 0 : index
    %2 = vector.load %arg2[%c0_3, %c0_4] : memref<1x32xf32, #tpu.memory_space<vmem>>, vector<1x32xf32>
    %cst = arith.constant dense<0.000000e+00> : vector<16xf32>
    %3 = vector.multi_reduction <add>, %0, %cst [1] : vector<16x32xf32> to vector<16xf32>
    %4 = vector.shape_cast %3 : vector<16xf32> to vector<16x1xf32>
    %cst_5 = arith.constant 3.200000e+01 : f32
    %5 = vector.broadcast %cst_5 : f32 to vector<16x1xf32>
    %6 = arith.divf %4, %5 : vector<16x1xf32>
    %7 = vector.broadcast %6 : vector<16x1xf32> to vector<16x32xf32>
    %8 = arith.subf %0, %7 : vector<16x32xf32>
    %9 = arith.mulf %8, %8 : vector<16x32xf32>
    %cst_6 = arith.constant dense<0.000000e+00> : vector<16xf32>
    %10 = vector.multi_reduction <add>, %9, %cst_6 [1] : vector<16x32xf32> to vector<16xf32>
    %11 = vector.shape_cast %10 : vector<16xf32> to vector<16x1xf32>
    %cst_7 = arith.constant 3.200000e+01 : f32
    %12 = vector.broadcast %cst_7 : f32 to vector<16x1xf32>
    %13 = arith.divf %11, %12 : vector<16x1xf32>
    %14 = vector.broadcast %6 : vector<16x1xf32> to vector<16x32xf32>
    %15 = arith.subf %0, %14 : vector<16x32xf32>
    %cst_8 = arith.constant 9.99999974E-6 : f32
    %16 = vector.broadcast %cst_8 : f32 to vector<16x1xf32>
    %17 = arith.addf %13, %16 : vector<16x1xf32>
    %18 = math.rsqrt %17 : vector<16x1xf32>
    %19 = vector.broadcast %18 : vector<16x1xf32> to vector<16x32xf32>
    %20 = arith.mulf %15, %19 : vector<16x32xf32>
    %21 = vector.broadcast %1 : vector<1x32xf32> to vector<16x32xf32>
    %22 = arith.mulf %20, %21 : vector<16x32xf32>
    %23 = vector.broadcast %2 : vector<1x32xf32> to vector<16x32xf32>
    %24 = arith.addf %22, %23 : vector<16x32xf32>
    %c0_9 = arith.constant 0 : index
    %c0_10 = arith.constant 0 : index
    %c0_11 = arith.constant 0 : index
    %25 = vector.load %arg3[%c0_9, %c0_10, %c0_11] : memref<2x1x8xf32, #tpu.memory_space<vmem>>, vector<2x1x8xf32>
    %26 = vector.shape_cast %25 : vector<2x1x8xf32> to vector<2x1x8xf32>
    %27 = vector.broadcast %26 : vector<2x1x8xf32> to vector<2x8x8xf32>
    %28 = arith.truncf %24 : vector<16x32xf32> to vector<16x32xbf16>
    %c0_12 = arith.constant 0 : index
    %c0_13 = arith.constant 0 : index
    %c0_14 = arith.constant 0 : index
    %29 = vector.load %arg4[%c0_12, %c0_13, %c0_14] : memref<2x32x96xbf16, #tpu.memory_space<vmem>>, vector<1x32x96xbf16>
    %30 = vector.shape_cast %29 : vector<1x32x96xbf16> to vector<32x96xbf16>
    %cst_15 = arith.constant dense<0.000000e+00> : vector<16x96xf32>
    %31 = tpu.matmul %28, %30, %cst_15 {dimension_numbers = #tpu.dot_dimension_numbers<[1], [0], [0], [1], [0, 0, 1, 1], [], []>} : vector<16x32xbf16>, vector<32x96xbf16>, vector<16x96xf32> -> vector<16x96xf32>
    %c0_16 = arith.constant 0 : index
    %c0_17 = arith.constant 0 : index
    %c0_18 = arith.constant 0 : index
    %32 = vector.load %arg5[%c0_16, %c0_17, %c0_18] : memref<2x1x96xf32, #tpu.memory_space<vmem>>, vector<1x1x96xf32>
    %33 = vector.shape_cast %32 : vector<1x1x96xf32> to vector<1x96xf32>
    %34 = vector.broadcast %33 : vector<1x96xf32> to vector<16x96xf32>
    %35 = arith.addf %31, %34 : vector<16x96xf32>
    %36 = vector.extract_strided_slice %35 {offsets = [0, 0], sizes = [16, 32], strides = [1, 1]} : vector<16x96xf32> to vector<16x32xf32>
    %37 = vector.shape_cast %36 : vector<16x32xf32> to vector<2x8x32xf32>
    %38 = vector.extract_strided_slice %35 {offsets = [0, 32], sizes = [16, 32], strides = [1, 1]} : vector<16x96xf32> to vector<16x32xf32>
    %39 = vector.shape_cast %38 : vector<16x32xf32> to vector<2x8x32xf32>
    %40 = vector.extract_strided_slice %35 {offsets = [0, 64], sizes = [16, 32], strides = [1, 1]} : vector<16x96xf32> to vector<16x32xf32>
    %41 = vector.shape_cast %40 : vector<16x32xf32> to vector<2x8x32xf32>
    %42 = vector.extract_strided_slice %37 {offsets = [0, 0, 0], sizes = [2, 8, 16], strides = [1, 1, 1]} : vector<2x8x32xf32> to vector<2x8x16xf32>
    %43 = vector.extract_strided_slice %39 {offsets = [0, 0, 0], sizes = [2, 8, 16], strides = [1, 1, 1]} : vector<2x8x32xf32> to vector<2x8x16xf32>
    "tpu.trace_start"() <{level = 10 : i32, message = "bqd,bkd->bqk"}> : () -> ()
    %cst_19 = arith.constant dense<0.000000e+00> : vector<2x8x8xf32>
    %44 = tpu.matmul %42, %43, %cst_19 {dimension_numbers = #tpu.dot_dimension_numbers<[2], [2], [1], [1], [0, 0, 0, 1, 1, 1], [0], [0]>} : vector<2x8x16xf32>, vector<2x8x16xf32>, vector<2x8x8xf32> -> vector<2x8x8xf32>
    "tpu.trace_stop"() : () -> ()
    %45 = arith.addf %44, %27 : vector<2x8x8xf32>
    %cst_20 = arith.constant dense<0xFF800000> : vector<2x8xf32>
    %46 = vector.multi_reduction <maximumf>, %45, %cst_20 [2] : vector<2x8x8xf32> to vector<2x8xf32>
    %47 = vector.shape_cast %46 : vector<2x8xf32> to vector<2x8x1xf32>
    %48 = vector.broadcast %47 : vector<2x8x1xf32> to vector<2x8x8xf32>
    %49 = arith.subf %45, %48 : vector<2x8x8xf32>
    %50 = math.exp %49 : vector<2x8x8xf32>
    %cst_21 = arith.constant dense<0.000000e+00> : vector<2x8xf32>
    %51 = vector.multi_reduction <add>, %50, %cst_21 [2] : vector<2x8x8xf32> to vector<2x8xf32>
    %52 = vector.shape_cast %51 : vector<2x8xf32> to vector<2x8x1xf32>
    %53 = tpu.reciprocal %52 {approx = true} : vector<2x8x1xf32> -> vector<2x8x1xf32>
    %54 = vector.broadcast %53 : vector<2x8x1xf32> to vector<2x8x8xf32>
    %55 = arith.mulf %50, %54 : vector<2x8x8xf32>
    %56 = vector.extract_strided_slice %41 {offsets = [0, 0, 0], sizes = [2, 8, 16], strides = [1, 1, 1]} : vector<2x8x32xf32> to vector<2x8x16xf32>
    "tpu.trace_start"() <{level = 10 : i32, message = "bqk,bkd->bqd"}> : () -> ()
    %cst_22 = arith.constant dense<0.000000e+00> : vector<2x8x16xf32>
    %57 = tpu.matmul %55, %56, %cst_22 {dimension_numbers = #tpu.dot_dimension_numbers<[2], [1], [1], [2], [0, 0, 0, 1, 1, 2], [0], [0]>} : vector<2x8x8xf32>, vector<2x8x16xf32>, vector<2x8x16xf32> -> vector<2x8x16xf32>
    "tpu.trace_stop"() : () -> ()
    %58 = vector.extract_strided_slice %37 {offsets = [0, 0, 16], sizes = [2, 8, 16], strides = [1, 1, 1]} : vector<2x8x32xf32> to vector<2x8x16xf32>
    %59 = vector.extract_strided_slice %39 {offsets = [0, 0, 16], sizes = [2, 8, 16], strides = [1, 1, 1]} : vector<2x8x32xf32> to vector<2x8x16xf32>
    "tpu.trace_start"() <{level = 10 : i32, message = "bqd,bkd->bqk"}> : () -> ()
    %cst_23 = arith.constant dense<0.000000e+00> : vector<2x8x8xf32>
    %60 = tpu.matmul %58, %59, %cst_23 {dimension_numbers = #tpu.dot_dimension_numbers<[2], [2], [1], [1], [0, 0, 0, 1, 1, 1], [0], [0]>} : vector<2x8x16xf32>, vector<2x8x16xf32>, vector<2x8x8xf32> -> vector<2x8x8xf32>
    "tpu.trace_stop"() : () -> ()
    %61 = arith.addf %60, %27 : vector<2x8x8xf32>
    %cst_24 = arith.constant dense<0xFF800000> : vector<2x8xf32>
    %62 = vector.multi_reduction <maximumf>, %61, %cst_24 [2] : vector<2x8x8xf32> to vector<2x8xf32>
    %63 = vector.shape_cast %62 : vector<2x8xf32> to vector<2x8x1xf32>
    %64 = vector.broadcast %63 : vector<2x8x1xf32> to vector<2x8x8xf32>
    %65 = arith.subf %61, %64 : vector<2x8x8xf32>
    %66 = math.exp %65 : vector<2x8x8xf32>
    %cst_25 = arith.constant dense<0.000000e+00> : vector<2x8xf32>
    %67 = vector.multi_reduction <add>, %66, %cst_25 [2] : vector<2x8x8xf32> to vector<2x8xf32>
    %68 = vector.shape_cast %67 : vector<2x8xf32> to vector<2x8x1xf32>
    %69 = tpu.reciprocal %68 {approx = true} : vector<2x8x1xf32> -> vector<2x8x1xf32>
    %70 = vector.broadcast %69 : vector<2x8x1xf32> to vector<2x8x8xf32>
    %71 = arith.mulf %66, %70 : vector<2x8x8xf32>
    %72 = vector.extract_strided_slice %41 {offsets = [0, 0, 16], sizes = [2, 8, 16], strides = [1, 1, 1]} : vector<2x8x32xf32> to vector<2x8x16xf32>
    "tpu.trace_start"() <{level = 10 : i32, message = "bqk,bkd->bqd"}> : () -> ()
    %cst_26 = arith.constant dense<0.000000e+00> : vector<2x8x16xf32>
    %73 = tpu.matmul %71, %72, %cst_26 {dimension_numbers = #tpu.dot_dimension_numbers<[2], [1], [1], [2], [0, 0, 0, 1, 1, 2], [0], [0]>} : vector<2x8x8xf32>, vector<2x8x16xf32>, vector<2x8x16xf32> -> vector<2x8x16xf32>
    "tpu.trace_stop"() : () -> ()
    %74 = tpu.concatenate %57, %73 in 2 : vector<2x8x16xf32>, vector<2x8x16xf32> -> vector<2x8x32xf32>
    %75 = vector.shape_cast %74 : vector<2x8x32xf32> to vector<16x32xf32>
    %76 = arith.truncf %75 : vector<16x32xf32> to vector<16x32xbf16>
    %c0_27 = arith.constant 0 : index
    %c0_28 = arith.constant 0 : index
    %c0_29 = arith.constant 0 : index
    %77 = vector.load %arg6[%c0_27, %c0_28, %c0_29] : memref<2x32x32xbf16, #tpu.memory_space<vmem>>, vector<1x32x32xbf16>
    %78 = vector.shape_cast %77 : vector<1x32x32xbf16> to vector<32x32xbf16>
    %cst_30 = arith.constant dense<0.000000e+00> : vector<16x32xf32>
    %79 = tpu.matmul %76, %78, %cst_30 {dimension_numbers = #tpu.dot_dimension_numbers<[1], [0], [0], [1], [0, 0, 1, 1], [], []>} : vector<16x32xbf16>, vector<32x32xbf16>, vector<16x32xf32> -> vector<16x32xf32>
    %c0_31 = arith.constant 0 : index
    %c0_32 = arith.constant 0 : index
    %c0_33 = arith.constant 0 : index
    %80 = vector.load %arg7[%c0_31, %c0_32, %c0_33] : memref<2x1x32xf32, #tpu.memory_space<vmem>>, vector<1x1x32xf32>
    %81 = vector.shape_cast %80 : vector<1x1x32xf32> to vector<1x32xf32>
    %82 = vector.broadcast %81 : vector<1x32xf32> to vector<16x32xf32>
    %83 = arith.addf %79, %82 : vector<16x32xf32>
    %84 = arith.addf %83, %24 : vector<16x32xf32>
    %c0_34 = arith.constant 0 : index
    %c0_35 = arith.constant 0 : index
    %c0_36 = arith.constant 0 : index
    %85 = vector.load %arg8[%c0_34, %c0_35, %c0_36] : memref<2x1x32xf32, #tpu.memory_space<vmem>>, vector<1x1x32xf32>
    %86 = vector.shape_cast %85 : vector<1x1x32xf32> to vector<1x32xf32>
    %c0_37 = arith.constant 0 : index
    %c0_38 = arith.constant 0 : index
    %c0_39 = arith.constant 0 : index
    %87 = vector.load %arg9[%c0_37, %c0_38, %c0_39] : memref<2x1x32xf32, #tpu.memory_space<vmem>>, vector<1x1x32xf32>
    %88 = vector.shape_cast %87 : vector<1x1x32xf32> to vector<1x32xf32>
    %cst_40 = arith.constant dense<0.000000e+00> : vector<16xf32>
    %89 = vector.multi_reduction <add>, %84, %cst_40 [1] : vector<16x32xf32> to vector<16xf32>
    %90 = vector.shape_cast %89 : vector<16xf32> to vector<16x1xf32>
    %cst_41 = arith.constant 3.200000e+01 : f32
    %91 = vector.broadcast %cst_41 : f32 to vector<16x1xf32>
    %92 = arith.divf %90, %91 : vector<16x1xf32>
    %93 = vector.broadcast %92 : vector<16x1xf32> to vector<16x32xf32>
    %94 = arith.subf %84, %93 : vector<16x32xf32>
    %95 = arith.mulf %94, %94 : vector<16x32xf32>
    %cst_42 = arith.constant dense<0.000000e+00> : vector<16xf32>
    %96 = vector.multi_reduction <add>, %95, %cst_42 [1] : vector<16x32xf32> to vector<16xf32>
    %97 = vector.shape_cast %96 : vector<16xf32> to vector<16x1xf32>
    %cst_43 = arith.constant 3.200000e+01 : f32
    %98 = vector.broadcast %cst_43 : f32 to vector<16x1xf32>
    %99 = arith.divf %97, %98 : vector<16x1xf32>
    %100 = vector.broadcast %92 : vector<16x1xf32> to vector<16x32xf32>
    %101 = arith.subf %84, %100 : vector<16x32xf32>
    %cst_44 = arith.constant 9.99999974E-6 : f32
    %102 = vector.broadcast %cst_44 : f32 to vector<16x1xf32>
    %103 = arith.addf %99, %102 : vector<16x1xf32>
    %104 = math.rsqrt %103 : vector<16x1xf32>
    %105 = vector.broadcast %104 : vector<16x1xf32> to vector<16x32xf32>
    %106 = arith.mulf %101, %105 : vector<16x32xf32>
    %107 = vector.broadcast %86 : vector<1x32xf32> to vector<16x32xf32>
    %108 = arith.mulf %106, %107 : vector<16x32xf32>
    %109 = vector.broadcast %88 : vector<1x32xf32> to vector<16x32xf32>
    %110 = arith.addf %108, %109 : vector<16x32xf32>
    %111 = arith.truncf %110 : vector<16x32xf32> to vector<16x32xbf16>
    %c0_45 = arith.constant 0 : index
    %c0_46 = arith.constant 0 : index
    %c0_47 = arith.constant 0 : index
    %112 = vector.load %arg10[%c0_45, %c0_46, %c0_47] : memref<2x32x64xbf16, #tpu.memory_space<vmem>>, vector<1x32x64xbf16>
    %113 = vector.shape_cast %112 : vector<1x32x64xbf16> to vector<32x64xbf16>
    %cst_48 = arith.constant dense<0.000000e+00> : vector<16x64xf32>
    %114 = tpu.matmul %111, %113, %cst_48 {dimension_numbers = #tpu.dot_dimension_numbers<[1], [0], [0], [1], [0, 0, 1, 1], [], []>} : vector<16x32xbf16>, vector<32x64xbf16>, vector<16x64xf32> -> vector<16x64xf32>
    %c0_49 = arith.constant 0 : index
    %c0_50 = arith.constant 0 : index
    %c0_51 = arith.constant 0 : index
    %115 = vector.load %arg11[%c0_49, %c0_50, %c0_51] : memref<2x1x64xf32, #tpu.memory_space<vmem>>, vector<1x1x64xf32>
    %116 = vector.shape_cast %115 : vector<1x1x64xf32> to vector<1x64xf32>
    %117 = vector.broadcast %116 : vector<1x64xf32> to vector<16x64xf32>
    %118 = arith.addf %114, %117 : vector<16x64xf32>
    %119 = arith.mulf %118, %118 : vector<16x64xf32>
    %120 = arith.mulf %118, %119 : vector<16x64xf32>
    %cst_52 = arith.constant 4.471500e-02 : f32
    %121 = vector.broadcast %cst_52 : f32 to vector<16x64xf32>
    %122 = arith.mulf %121, %120 : vector<16x64xf32>
    %123 = arith.addf %118, %122 : vector<16x64xf32>
    %cst_53 = arith.constant 0.797884583 : f32
    %124 = vector.broadcast %cst_53 : f32 to vector<16x64xf32>
    %125 = arith.mulf %124, %123 : vector<16x64xf32>
    %126 = math.tanh %125 : vector<16x64xf32>
    %cst_54 = arith.constant 1.000000e+00 : f32
    %127 = vector.broadcast %cst_54 : f32 to vector<16x64xf32>
    %128 = arith.addf %127, %126 : vector<16x64xf32>
    %cst_55 = arith.constant 5.000000e-01 : f32
    %129 = vector.broadcast %cst_55 : f32 to vector<16x64xf32>
    %130 = arith.mulf %129, %128 : vector<16x64xf32>
    %131 = arith.mulf %118, %130 : vector<16x64xf32>
    %132 = arith.truncf %131 : vector<16x64xf32> to vector<16x64xbf16>
    %c0_56 = arith.constant 0 : index
    %c0_57 = arith.constant 0 : index
    %c0_58 = arith.constant 0 : index
    %133 = vector.load %arg12[%c0_56, %c0_57, %c0_58] : memref<2x64x32xbf16, #tpu.memory_space<vmem>>, vector<1x64x32xbf16>
    %134 = vector.shape_cast %133 : vector<1x64x32xbf16> to vector<64x32xbf16>
    %cst_59 = arith.constant dense<0.000000e+00> : vector<16x32xf32>
    %135 = tpu.matmul %132, %134, %cst_59 {dimension_numbers = #tpu.dot_dimension_numbers<[1], [0], [0], [1], [0, 0, 1, 1], [], []>} : vector<16x64xbf16>, vector<64x32xbf16>, vector<16x32xf32> -> vector<16x32xf32>
    %c0_60 = arith.constant 0 : index
    %c0_61 = arith.constant 0 : index
    %c0_62 = arith.constant 0 : index
    %136 = vector.load %arg13[%c0_60, %c0_61, %c0_62] : memref<2x1x32xf32, #tpu.memory_space<vmem>>, vector<1x1x32xf32>
    %137 = vector.shape_cast %136 : vector<1x1x32xf32> to vector<1x32xf32>
    %138 = vector.broadcast %137 : vector<1x32xf32> to vector<16x32xf32>
    %139 = arith.addf %135, %138 : vector<16x32xf32>
    %140 = arith.addf %139, %110 : vector<16x32xf32>
    %c0_63 = arith.constant 0 : index
    %c0_64 = arith.constant 0 : index
    %c0_65 = arith.constant 0 : index
    %141 = vector.load %arg14[%c0_63, %c0_64, %c0_65] : memref<2x1x32xf32, #tpu.memory_space<vmem>>, vector<1x1x32xf32>
    %142 = vector.shape_cast %141 : vector<1x1x32xf32> to vector<1x32xf32>
    %c0_66 = arith.constant 0 : index
    %c0_67 = arith.constant 0 : index
    %c0_68 = arith.constant 0 : index
    %143 = vector.load %arg15[%c0_66, %c0_67, %c0_68] : memref<2x1x32xf32, #tpu.memory_space<vmem>>, vector<1x1x32xf32>
    %144 = vector.shape_cast %143 : vector<1x1x32xf32> to vector<1x32xf32>
    %cst_69 = arith.constant dense<0.000000e+00> : vector<16xf32>
    %145 = vector.multi_reduction <add>, %140, %cst_69 [1] : vector<16x32xf32> to vector<16xf32>
    %146 = vector.shape_cast %145 : vector<16xf32> to vector<16x1xf32>
    %cst_70 = arith.constant 3.200000e+01 : f32
    %147 = vector.broadcast %cst_70 : f32 to vector<16x1xf32>
    %148 = arith.divf %146, %147 : vector<16x1xf32>
    %149 = vector.broadcast %148 : vector<16x1xf32> to vector<16x32xf32>
    %150 = arith.subf %140, %149 : vector<16x32xf32>
    %151 = arith.mulf %150, %150 : vector<16x32xf32>
    %cst_71 = arith.constant dense<0.000000e+00> : vector<16xf32>
    %152 = vector.multi_reduction <add>, %151, %cst_71 [1] : vector<16x32xf32> to vector<16xf32>
    %153 = vector.shape_cast %152 : vector<16xf32> to vector<16x1xf32>
    %cst_72 = arith.constant 3.200000e+01 : f32
    %154 = vector.broadcast %cst_72 : f32 to vector<16x1xf32>
    %155 = arith.divf %153, %154 : vector<16x1xf32>
    %156 = vector.broadcast %148 : vector<16x1xf32> to vector<16x32xf32>
    %157 = arith.subf %140, %156 : vector<16x32xf32>
    %cst_73 = arith.constant 9.99999974E-6 : f32
    %158 = vector.broadcast %cst_73 : f32 to vector<16x1xf32>
    %159 = arith.addf %155, %158 : vector<16x1xf32>
    %160 = math.rsqrt %159 : vector<16x1xf32>
    %161 = vector.broadcast %160 : vector<16x1xf32> to vector<16x32xf32>
    %162 = arith.mulf %157, %161 : vector<16x32xf32>
    %163 = vector.broadcast %142 : vector<1x32xf32> to vector<16x32xf32>
    %164 = arith.mulf %162, %163 : vector<16x32xf32>
    %165 = vector.broadcast %144 : vector<1x32xf32> to vector<16x32xf32>
    %166 = arith.addf %164, %165 : vector<16x32xf32>
    %167 = arith.truncf %166 : vector<16x32xf32> to vector<16x32xbf16>
    %c1 = arith.constant 1 : index
    %c0_74 = arith.constant 0 : index
    %c0_75 = arith.constant 0 : index
    %168 = vector.load %arg4[%c1, %c0_74, %c0_75] : memref<2x32x96xbf16, #tpu.memory_space<vmem>>, vector<1x32x96xbf16>
    %169 = vector.shape_cast %168 : vector<1x32x96xbf16> to vector<32x96xbf16>
    %cst_76 = arith.constant dense<0.000000e+00> : vector<16x96xf32>
    %170 = tpu.matmul %167, %169, %cst_76 {dimension_numbers = #tpu.dot_dimension_numbers<[1], [0], [0], [1], [0, 0, 1, 1], [], []>} : vector<16x32xbf16>, vector<32x96xbf16>, vector<16x96xf32> -> vector<16x96xf32>
    %c1_77 = arith.constant 1 : index
    %c0_78 = arith.constant 0 : index
    %c0_79 = arith.constant 0 : index
    %171 = vector.load %arg5[%c1_77, %c0_78, %c0_79] : memref<2x1x96xf32, #tpu.memory_space<vmem>>, vector<1x1x96xf32>
    %172 = vector.shape_cast %171 : vector<1x1x96xf32> to vector<1x96xf32>
    %173 = vector.broadcast %172 : vector<1x96xf32> to vector<16x96xf32>
    %174 = arith.addf %170, %173 : vector<16x96xf32>
    %175 = vector.extract_strided_slice %174 {offsets = [0, 0], sizes = [16, 32], strides = [1, 1]} : vector<16x96xf32> to vector<16x32xf32>
    %176 = vector.shape_cast %175 : vector<16x32xf32> to vector<2x8x32xf32>
    %177 = vector.extract_strided_slice %174 {offsets = [0, 32], sizes = [16, 32], strides = [1, 1]} : vector<16x96xf32> to vector<16x32xf32>
    %178 = vector.shape_cast %177 : vector<16x32xf32> to vector<2x8x32xf32>
    %179 = vector.extract_strided_slice %174 {offsets = [0, 64], sizes = [16, 32], strides = [1, 1]} : vector<16x96xf32> to vector<16x32xf32>
    %180 = vector.shape_cast %179 : vector<16x32xf32> to vector<2x8x32xf32>
    %181 = vector.extract_strided_slice %176 {offsets = [0, 0, 0], sizes = [2, 8, 16], strides = [1, 1, 1]} : vector<2x8x32xf32> to vector<2x8x16xf32>
    %182 = vector.extract_strided_slice %178 {offsets = [0, 0, 0], sizes = [2, 8, 16], strides = [1, 1, 1]} : vector<2x8x32xf32> to vector<2x8x16xf32>
    "tpu.trace_start"() <{level = 10 : i32, message = "bqd,bkd->bqk"}> : () -> ()
    %cst_80 = arith.constant dense<0.000000e+00> : vector<2x8x8xf32>
    %183 = tpu.matmul %181, %182, %cst_80 {dimension_numbers = #tpu.dot_dimension_numbers<[2], [2], [1], [1], [0, 0, 0, 1, 1, 1], [0], [0]>} : vector<2x8x16xf32>, vector<2x8x16xf32>, vector<2x8x8xf32> -> vector<2x8x8xf32>
    "tpu.trace_stop"() : () -> ()
    %184 = arith.addf %183, %27 : vector<2x8x8xf32>
    %cst_81 = arith.constant dense<0xFF800000> : vector<2x8xf32>
    %185 = vector.multi_reduction <maximumf>, %184, %cst_81 [2] : vector<2x8x8xf32> to vector<2x8xf32>
    %186 = vector.shape_cast %185 : vector<2x8xf32> to vector<2x8x1xf32>
    %187 = vector.broadcast %186 : vector<2x8x1xf32> to vector<2x8x8xf32>
    %188 = arith.subf %184, %187 : vector<2x8x8xf32>
    %189 = math.exp %188 : vector<2x8x8xf32>
    %cst_82 = arith.constant dense<0.000000e+00> : vector<2x8xf32>
    %190 = vector.multi_reduction <add>, %189, %cst_82 [2] : vector<2x8x8xf32> to vector<2x8xf32>
    %191 = vector.shape_cast %190 : vector<2x8xf32> to vector<2x8x1xf32>
    %192 = tpu.reciprocal %191 {approx = true} : vector<2x8x1xf32> -> vector<2x8x1xf32>
    %193 = vector.broadcast %192 : vector<2x8x1xf32> to vector<2x8x8xf32>
    %194 = arith.mulf %189, %193 : vector<2x8x8xf32>
    %195 = vector.extract_strided_slice %180 {offsets = [0, 0, 0], sizes = [2, 8, 16], strides = [1, 1, 1]} : vector<2x8x32xf32> to vector<2x8x16xf32>
    "tpu.trace_start"() <{level = 10 : i32, message = "bqk,bkd->bqd"}> : () -> ()
    %cst_83 = arith.constant dense<0.000000e+00> : vector<2x8x16xf32>
    %196 = tpu.matmul %194, %195, %cst_83 {dimension_numbers = #tpu.dot_dimension_numbers<[2], [1], [1], [2], [0, 0, 0, 1, 1, 2], [0], [0]>} : vector<2x8x8xf32>, vector<2x8x16xf32>, vector<2x8x16xf32> -> vector<2x8x16xf32>
    "tpu.trace_stop"() : () -> ()
    %197 = vector.extract_strided_slice %176 {offsets = [0, 0, 16], sizes = [2, 8, 16], strides = [1, 1, 1]} : vector<2x8x32xf32> to vector<2x8x16xf32>
    %198 = vector.extract_strided_slice %178 {offsets = [0, 0, 16], sizes = [2, 8, 16], strides = [1, 1, 1]} : vector<2x8x32xf32> to vector<2x8x16xf32>
    "tpu.trace_start"() <{level = 10 : i32, message = "bqd,bkd->bqk"}> : () -> ()
    %cst_84 = arith.constant dense<0.000000e+00> : vector<2x8x8xf32>
    %199 = tpu.matmul %197, %198, %cst_84 {dimension_numbers = #tpu.dot_dimension_numbers<[2], [2], [1], [1], [0, 0, 0, 1, 1, 1], [0], [0]>} : vector<2x8x16xf32>, vector<2x8x16xf32>, vector<2x8x8xf32> -> vector<2x8x8xf32>
    "tpu.trace_stop"() : () -> ()
    %200 = arith.addf %199, %27 : vector<2x8x8xf32>
    %cst_85 = arith.constant dense<0xFF800000> : vector<2x8xf32>
    %201 = vector.multi_reduction <maximumf>, %200, %cst_85 [2] : vector<2x8x8xf32> to vector<2x8xf32>
    %202 = vector.shape_cast %201 : vector<2x8xf32> to vector<2x8x1xf32>
    %203 = vector.broadcast %202 : vector<2x8x1xf32> to vector<2x8x8xf32>
    %204 = arith.subf %200, %203 : vector<2x8x8xf32>
    %205 = math.exp %204 : vector<2x8x8xf32>
    %cst_86 = arith.constant dense<0.000000e+00> : vector<2x8xf32>
    %206 = vector.multi_reduction <add>, %205, %cst_86 [2] : vector<2x8x8xf32> to vector<2x8xf32>
    %207 = vector.shape_cast %206 : vector<2x8xf32> to vector<2x8x1xf32>
    %208 = tpu.reciprocal %207 {approx = true} : vector<2x8x1xf32> -> vector<2x8x1xf32>
    %209 = vector.broadcast %208 : vector<2x8x1xf32> to vector<2x8x8xf32>
    %210 = arith.mulf %205, %209 : vector<2x8x8xf32>
    %211 = vector.extract_strided_slice %180 {offsets = [0, 0, 16], sizes = [2, 8, 16], strides = [1, 1, 1]} : vector<2x8x32xf32> to vector<2x8x16xf32>
    "tpu.trace_start"() <{level = 10 : i32, message = "bqk,bkd->bqd"}> : () -> ()
    %cst_87 = arith.constant dense<0.000000e+00> : vector<2x8x16xf32>
    %212 = tpu.matmul %210, %211, %cst_87 {dimension_numbers = #tpu.dot_dimension_numbers<[2], [1], [1], [2], [0, 0, 0, 1, 1, 2], [0], [0]>} : vector<2x8x8xf32>, vector<2x8x16xf32>, vector<2x8x16xf32> -> vector<2x8x16xf32>
    "tpu.trace_stop"() : () -> ()
    %213 = tpu.concatenate %196, %212 in 2 : vector<2x8x16xf32>, vector<2x8x16xf32> -> vector<2x8x32xf32>
    %214 = vector.shape_cast %213 : vector<2x8x32xf32> to vector<16x32xf32>
    %215 = arith.truncf %214 : vector<16x32xf32> to vector<16x32xbf16>
    %c1_88 = arith.constant 1 : index
    %c0_89 = arith.constant 0 : index
    %c0_90 = arith.constant 0 : index
    %216 = vector.load %arg6[%c1_88, %c0_89, %c0_90] : memref<2x32x32xbf16, #tpu.memory_space<vmem>>, vector<1x32x32xbf16>
    %217 = vector.shape_cast %216 : vector<1x32x32xbf16> to vector<32x32xbf16>
    %cst_91 = arith.constant dense<0.000000e+00> : vector<16x32xf32>
    %218 = tpu.matmul %215, %217, %cst_91 {dimension_numbers = #tpu.dot_dimension_numbers<[1], [0], [0], [1], [0, 0, 1, 1], [], []>} : vector<16x32xbf16>, vector<32x32xbf16>, vector<16x32xf32> -> vector<16x32xf32>
    %c1_92 = arith.constant 1 : index
    %c0_93 = arith.constant 0 : index
    %c0_94 = arith.constant 0 : index
    %219 = vector.load %arg7[%c1_92, %c0_93, %c0_94] : memref<2x1x32xf32, #tpu.memory_space<vmem>>, vector<1x1x32xf32>
    %220 = vector.shape_cast %219 : vector<1x1x32xf32> to vector<1x32xf32>
    %221 = vector.broadcast %220 : vector<1x32xf32> to vector<16x32xf32>
    %222 = arith.addf %218, %221 : vector<16x32xf32>
    %223 = arith.addf %222, %166 : vector<16x32xf32>
    %c1_95 = arith.constant 1 : index
    %c0_96 = arith.constant 0 : index
    %c0_97 = arith.constant 0 : index
    %224 = vector.load %arg8[%c1_95, %c0_96, %c0_97] : memref<2x1x32xf32, #tpu.memory_space<vmem>>, vector<1x1x32xf32>
    %225 = vector.shape_cast %224 : vector<1x1x32xf32> to vector<1x32xf32>
    %c1_98 = arith.constant 1 : index
    %c0_99 = arith.constant 0 : index
    %c0_100 = arith.constant 0 : index
    %226 = vector.load %arg9[%c1_98, %c0_99, %c0_100] : memref<2x1x32xf32, #tpu.memory_space<vmem>>, vector<1x1x32xf32>
    %227 = vector.shape_cast %226 : vector<1x1x32xf32> to vector<1x32xf32>
    %cst_101 = arith.constant dense<0.000000e+00> : vector<16xf32>
    %228 = vector.multi_reduction <add>, %223, %cst_101 [1] : vector<16x32xf32> to vector<16xf32>
    %229 = vector.shape_cast %228 : vector<16xf32> to vector<16x1xf32>
    %cst_102 = arith.constant 3.200000e+01 : f32
    %230 = vector.broadcast %cst_102 : f32 to vector<16x1xf32>
    %231 = arith.divf %229, %230 : vector<16x1xf32>
    %232 = vector.broadcast %231 : vector<16x1xf32> to vector<16x32xf32>
    %233 = arith.subf %223, %232 : vector<16x32xf32>
    %234 = arith.mulf %233, %233 : vector<16x32xf32>
    %cst_103 = arith.constant dense<0.000000e+00> : vector<16xf32>
    %235 = vector.multi_reduction <add>, %234, %cst_103 [1] : vector<16x32xf32> to vector<16xf32>
    %236 = vector.shape_cast %235 : vector<16xf32> to vector<16x1xf32>
    %cst_104 = arith.constant 3.200000e+01 : f32
    %237 = vector.broadcast %cst_104 : f32 to vector<16x1xf32>
    %238 = arith.divf %236, %237 : vector<16x1xf32>
    %239 = vector.broadcast %231 : vector<16x1xf32> to vector<16x32xf32>
    %240 = arith.subf %223, %239 : vector<16x32xf32>
    %cst_105 = arith.constant 9.99999974E-6 : f32
    %241 = vector.broadcast %cst_105 : f32 to vector<16x1xf32>
    %242 = arith.addf %238, %241 : vector<16x1xf32>
    %243 = math.rsqrt %242 : vector<16x1xf32>
    %244 = vector.broadcast %243 : vector<16x1xf32> to vector<16x32xf32>
    %245 = arith.mulf %240, %244 : vector<16x32xf32>
    %246 = vector.broadcast %225 : vector<1x32xf32> to vector<16x32xf32>
    %247 = arith.mulf %245, %246 : vector<16x32xf32>
    %248 = vector.broadcast %227 : vector<1x32xf32> to vector<16x32xf32>
    %249 = arith.addf %247, %248 : vector<16x32xf32>
    %250 = arith.truncf %249 : vector<16x32xf32> to vector<16x32xbf16>
    %c1_106 = arith.constant 1 : index
    %c0_107 = arith.constant 0 : index
    %c0_108 = arith.constant 0 : index
    %251 = vector.load %arg10[%c1_106, %c0_107, %c0_108] : memref<2x32x64xbf16, #tpu.memory_space<vmem>>, vector<1x32x64xbf16>
    %252 = vector.shape_cast %251 : vector<1x32x64xbf16> to vector<32x64xbf16>
    %cst_109 = arith.constant dense<0.000000e+00> : vector<16x64xf32>
    %253 = tpu.matmul %250, %252, %cst_109 {dimension_numbers = #tpu.dot_dimension_numbers<[1], [0], [0], [1], [0, 0, 1, 1], [], []>} : vector<16x32xbf16>, vector<32x64xbf16>, vector<16x64xf32> -> vector<16x64xf32>
    %c1_110 = arith.constant 1 : index
    %c0_111 = arith.constant 0 : index
    %c0_112 = arith.constant 0 : index
    %254 = vector.load %arg11[%c1_110, %c0_111, %c0_112] : memref<2x1x64xf32, #tpu.memory_space<vmem>>, vector<1x1x64xf32>
    %255 = vector.shape_cast %254 : vector<1x1x64xf32> to vector<1x64xf32>
    %256 = vector.broadcast %255 : vector<1x64xf32> to vector<16x64xf32>
    %257 = arith.addf %253, %256 : vector<16x64xf32>
    %258 = arith.mulf %257, %257 : vector<16x64xf32>
    %259 = arith.mulf %257, %258 : vector<16x64xf32>
    %cst_113 = arith.constant 4.471500e-02 : f32
    %260 = vector.broadcast %cst_113 : f32 to vector<16x64xf32>
    %261 = arith.mulf %260, %259 : vector<16x64xf32>
    %262 = arith.addf %257, %261 : vector<16x64xf32>
    %cst_114 = arith.constant 0.797884583 : f32
    %263 = vector.broadcast %cst_114 : f32 to vector<16x64xf32>
    %264 = arith.mulf %263, %262 : vector<16x64xf32>
    %265 = math.tanh %264 : vector<16x64xf32>
    %cst_115 = arith.constant 1.000000e+00 : f32
    %266 = vector.broadcast %cst_115 : f32 to vector<16x64xf32>
    %267 = arith.addf %266, %265 : vector<16x64xf32>
    %cst_116 = arith.constant 5.000000e-01 : f32
    %268 = vector.broadcast %cst_116 : f32 to vector<16x64xf32>
    %269 = arith.mulf %268, %267 : vector<16x64xf32>
    %270 = arith.mulf %257, %269 : vector<16x64xf32>
    %271 = arith.truncf %270 : vector<16x64xf32> to vector<16x64xbf16>
    %c1_117 = arith.constant 1 : index
    %c0_118 = arith.constant 0 : index
    %c0_119 = arith.constant 0 : index
    %272 = vector.load %arg12[%c1_117, %c0_118, %c0_119] : memref<2x64x32xbf16, #tpu.memory_space<vmem>>, vector<1x64x32xbf16>
    %273 = vector.shape_cast %272 : vector<1x64x32xbf16> to vector<64x32xbf16>
    %cst_120 = arith.constant dense<0.000000e+00> : vector<16x32xf32>
    %274 = tpu.matmul %271, %273, %cst_120 {dimension_numbers = #tpu.dot_dimension_numbers<[1], [0], [0], [1], [0, 0, 1, 1], [], []>} : vector<16x64xbf16>, vector<64x32xbf16>, vector<16x32xf32> -> vector<16x32xf32>
    %c1_121 = arith.constant 1 : index
    %c0_122 = arith.constant 0 : index
    %c0_123 = arith.constant 0 : index
    %275 = vector.load %arg13[%c1_121, %c0_122, %c0_123] : memref<2x1x32xf32, #tpu.memory_space<vmem>>, vector<1x1x32xf32>
    %276 = vector.shape_cast %275 : vector<1x1x32xf32> to vector<1x32xf32>
    %277 = vector.broadcast %276 : vector<1x32xf32> to vector<16x32xf32>
    %278 = arith.addf %274, %277 : vector<16x32xf32>
    %279 = arith.addf %278, %249 : vector<16x32xf32>
    %c1_124 = arith.constant 1 : index
    %c0_125 = arith.constant 0 : index
    %c0_126 = arith.constant 0 : index
    %280 = vector.load %arg14[%c1_124, %c0_125, %c0_126] : memref<2x1x32xf32, #tpu.memory_space<vmem>>, vector<1x1x32xf32>
    %281 = vector.shape_cast %280 : vector<1x1x32xf32> to vector<1x32xf32>
    %c1_127 = arith.constant 1 : index
    %c0_128 = arith.constant 0 : index
    %c0_129 = arith.constant 0 : index
    %282 = vector.load %arg15[%c1_127, %c0_128, %c0_129] : memref<2x1x32xf32, #tpu.memory_space<vmem>>, vector<1x1x32xf32>
    %283 = vector.shape_cast %282 : vector<1x1x32xf32> to vector<1x32xf32>
    %cst_130 = arith.constant dense<0.000000e+00> : vector<16xf32>
    %284 = vector.multi_reduction <add>, %279, %cst_130 [1] : vector<16x32xf32> to vector<16xf32>
    %285 = vector.shape_cast %284 : vector<16xf32> to vector<16x1xf32>
    %cst_131 = arith.constant 3.200000e+01 : f32
    %286 = vector.broadcast %cst_131 : f32 to vector<16x1xf32>
    %287 = arith.divf %285, %286 : vector<16x1xf32>
    %288 = vector.broadcast %287 : vector<16x1xf32> to vector<16x32xf32>
    %289 = arith.subf %279, %288 : vector<16x32xf32>
    %290 = arith.mulf %289, %289 : vector<16x32xf32>
    %cst_132 = arith.constant dense<0.000000e+00> : vector<16xf32>
    %291 = vector.multi_reduction <add>, %290, %cst_132 [1] : vector<16x32xf32> to vector<16xf32>
    %292 = vector.shape_cast %291 : vector<16xf32> to vector<16x1xf32>
    %cst_133 = arith.constant 3.200000e+01 : f32
    %293 = vector.broadcast %cst_133 : f32 to vector<16x1xf32>
    %294 = arith.divf %292, %293 : vector<16x1xf32>
    %295 = vector.broadcast %287 : vector<16x1xf32> to vector<16x32xf32>
    %296 = arith.subf %279, %295 : vector<16x32xf32>
    %cst_134 = arith.constant 9.99999974E-6 : f32
    %297 = vector.broadcast %cst_134 : f32 to vector<16x1xf32>
    %298 = arith.addf %294, %297 : vector<16x1xf32>
    %299 = math.rsqrt %298 : vector<16x1xf32>
    %300 = vector.broadcast %299 : vector<16x1xf32> to vector<16x32xf32>
    %301 = arith.mulf %296, %300 : vector<16x32xf32>
    %302 = vector.broadcast %281 : vector<1x32xf32> to vector<16x32xf32>
    %303 = arith.mulf %301, %302 : vector<16x32xf32>
    %304 = vector.broadcast %283 : vector<1x32xf32> to vector<16x32xf32>
    %305 = arith.addf %303, %304 : vector<16x32xf32>
    %306 = vector.shape_cast %305 : vector<16x32xf32> to vector<2x8x32xf32>
    %307 = vector.extract_strided_slice %306 {offsets = [0, 0, 0], sizes = [2, 1, 32], strides = [1, 1, 1]} : vector<2x8x32xf32> to vector<2x1x32xf32>
    %308 = vector.shape_cast %307 : vector<2x1x32xf32> to vector<2x32xf32>
    %309 = arith.truncf %308 : vector<2x32xf32> to vector<2x32xbf16>
    %c0_135 = arith.constant 0 : index
    %c0_136 = arith.constant 0 : index
    %310 = vector.load %arg16[%c0_135, %c0_136] : memref<32x32xbf16, #tpu.memory_space<vmem>>, vector<32x32xbf16>
    %cst_137 = arith.constant dense<0.000000e+00> : vector<2x32xf32>
    %311 = tpu.matmul %309, %310, %cst_137 {dimension_numbers = #tpu.dot_dimension_numbers<[1], [0], [0], [1], [0, 0, 1, 1], [], []>} : vector<2x32xbf16>, vector<32x32xbf16>, vector<2x32xf32> -> vector<2x32xf32>
    %c0_138 = arith.constant 0 : index
    %c0_139 = arith.constant 0 : index
    %312 = vector.load %arg17[%c0_138, %c0_139] : memref<1x32xf32, #tpu.memory_space<vmem>>, vector<1x32xf32>
    %313 = vector.broadcast %312 : vector<1x32xf32> to vector<2x32xf32>
    %314 = arith.addf %311, %313 : vector<2x32xf32>
    %315 = math.tanh %314 : vector<2x32xf32>
    %316 = arith.truncf %315 : vector<2x32xf32> to vector<2x32xbf16>
    %c0_140 = arith.constant 0 : index
    %c0_141 = arith.constant 0 : index
    %317 = vector.load %arg18[%c0_140, %c0_141] : memref<32x128xbf16, #tpu.memory_space<vmem>>, vector<32x128xbf16>
    %cst_142 = arith.constant dense<0.000000e+00> : vector<2x128xf32>
    %318 = tpu.matmul %316, %317, %cst_142 {dimension_numbers = #tpu.dot_dimension_numbers<[1], [0], [0], [1], [0, 0, 1, 1], [], []>} : vector<2x32xbf16>, vector<32x128xbf16>, vector<2x128xf32> -> vector<2x128xf32>
    %c0_143 = arith.constant 0 : index
    %c0_144 = arith.constant 0 : index
    %319 = vector.load %arg19[%c0_143, %c0_144] : memref<1x128xf32, #tpu.memory_space<vmem>>, vector<1x128xf32>
    %320 = vector.broadcast %319 : vector<1x128xf32> to vector<2x128xf32>
    %321 = arith.addf %318, %320 : vector<2x128xf32>
    %c0_145 = arith.constant 0 : index
    %c0_146 = arith.constant 0 : index
    %322 = vector.load %arg20[%c0_145, %c0_146] : memref<2x128xf32, #tpu.memory_space<vmem>>, vector<2x128xf32>
    tpu.vector_store %arg20[%c0_145, %c0_146], %321 {strides = array<i32>} : memref<2x128xf32, #tpu.memory_space<vmem>>, vector<2x128xf32>,
    return
  }
}

</mosaic_0001>

<bundles_post_ra>
// kernel: model_forward.1
= control target key start
LH: loop header
LB: loop body
LE: loop exit
PB: predicated region body
PF: predicated region fallthrough
CT: control target
= control target key end

     0   :  { %s2155_s0 = inlined_call_operand.vmem [shape: f32[16,32], index: 0, kind: input, shape index: {}]   ;;  %s2156_s1 = inlined_call_operand.vmem [shape: f32[1,32], index: 1, kind: input, shape index: {}]   ;;  %s2157_s2 = inlined_call_operand.vmem [shape: f32[1,32], index: 2, kind: input, shape index: {}]   ;;  %s2158_s3 = inlined_call_operand.vmem [shape: f32[2,1,8], index: 3, kind: input, shape index: {}]   ;;  %s2159_s4 = inlined_call_operand.vmem [shape: bf16[2,32,96], index: 4, kind: input, shape index: {}]   ;;  %s2160_s5 = inlined_call_operand.vmem [shape: f32[2,1,96], index: 5, kind: input, shape index: {}]   ;;  %s2161_s6 = inlined_call_operand.vmem [shape: bf16[2,32,32], index: 6, kind: input, shape index: {}]   ;;  %s2162_s7 = inlined_call_operand.vmem [shape: f32[2,1,32], index: 7, kind: input, shape index: {}]   ;;  %s2163_s8 = inlined_call_operand.vmem [shape: f32[2,1,32], index: 8, kind: input, shape index: {}]   ;;  %s2164_s9 = inlined_call_operand.vmem [shape: f32[2,1,32], index: 9, kind: input, shape index: {}]   ;;  %s2165_s10 = inlined_call_operand.vmem [shape: bf16[2,32,64], index: 10, kind: input, shape index: {}]   ;;  %s2166_s11 = inlined_call_operand.vmem [shape: f32[2,1,64], index: 11, kind: input, shape index: {}]   ;;  %s2167_s12 = inlined_call_operand.vmem [shape: bf16[2,64,32], index: 12, kind: input, shape index: {}]   ;;  %s2168_s13 = inlined_call_operand.vmem [shape: f32[2,1,32], index: 13, kind: input, shape index: {}]   ;;  %s2169_s14 = inlined_call_operand.vmem [shape: f32[2,1,32], index: 14, kind: input, shape index: {}]   ;;  %s2170_s15 = inlined_call_operand.vmem [shape: f32[2,1,32], index: 15, kind: input, shape index: {}]   ;;  %s2171_s16 = inlined_call_operand.vmem [shape: bf16[32,32], index: 16, kind: input, shape index: {}]   ;;  %s2172_s17 = inlined_call_operand.vmem [shape: f32[1,32], index: 17, kind: input, shape index: {}]   ;;  %s2173_s18 = inlined_call_operand.vmem [shape: bf16[32,128], index: 18, kind: input, shape index: {}]   ;;  %s2174_s19 = inlined_call_operand.vmem [shape: f32[1,128], index: 19, kind: input, shape index: {}]   ;;  %s2175_s20 = inlined_call_operand.hbm [shape: f32[2,128], index: 20, kind: output, shape index: {}]  }
   0x1   :  { %2182 = sst [smem:[#allocation5_spill]] %s2155_s0 }
   0x2   :  { %2183 = sst [smem:[#allocation6_spill]] %s2156_s1 }
   0x3   :  { %2184 = sst [smem:[#allocation7_spill]] %s2157_s2 }
   0x4   :  { %2185 = sst [smem:[#allocation8_spill]] %s2158_s3 }
   0x5   :  { %2186 = sst [smem:[#allocation9_spill]] %s2159_s4 }
   0x6   :  { %s2187_s23 = sld [smem:[#allocation5_spill]]  ;;  %vm71_vm0 = vcmask 261120  }
   0xc   :  { %v67_v0 = vld [vmem:[%s2187_s23] sm:$0xff]  ;;  %v68_v1 = vld [vmem:[%s2187_s23 + $0x8] sm:$0xff] }
   0xd   :  { %v72_v2 = vsel %vm71_vm0, %v67_v0, 0.0  ;;  %v75_v3 = vsel %vm71_vm0, %v68_v1, 0.0 }
   0xe   :  { %73 = vadd.xlane.f32.xlu0 %v72_v2 }
   0xf   :  { %25 = vsyncpa [#allocation3], 0  ;;  %v1719_v4 = vmov 32.0   ;;  %s2188_s26 = sld [smem:[#allocation9_spill]]  ;;  %v1609_v52 = vld [vmem:[%s2160_s5] ss:$0 sm:$0xff] }
  0x10   :  { %1629 = vrcp.f32 %v1719_v4  ;;  %s2189_s30 = sld [smem:[#allocation6_spill]]  ;;  %s1720_s24 = smov 80   ;;  %vm182_vm8 = vcmask 130048   ;;  %vm234_vm9 = vcmask 64512  }
  0x11   :  { %s2190_s1 = sld [smem:[#allocation7_spill]]  ;;  %s1721_s2 = smov 96  }
  0x12   :  { %s1722_s25 = smov 112   ;;  %s2191_s28 = sld [smem:[#allocation8_spill]] }
  0x13   :  { %s2180_s0 = smov 48   ;;  %s2179_s22 = smov 16  }
  0x15   :  { %v1556_v21 = vld [vmem:[%s2188_s26 + $0x8] sm:$0xff]  ;;  %v1555_v23 = vld [vmem:[%s2188_s26] sm:$0xff] }
  0x16   :  { %76 = vadd.xlane.f32.xlu0 %v75_v3  ;;  %v1630_v5 = vpop.eup %1629  ;;  %171 = vmatpush.bf16.msra.mxu0 %v1556_v21  ;;  %v1607_v42 = vld [vmem:[%s2189_s30] ss:$0 sm:$0xff]  ;;  %s1723_s30 = smov 64  }
  0x17   :  { %v79_v6 = vmul.f32 32.0, %v1630_v5  ;;  %vm83_vm1 = vweird.f32 %v1630_v5  ;;  %v1608_v47 = vld [vmem:[%s2190_s1] ss:$0 sm:$0xff] }
  0x18   :  { %v1899_v63 = vld [vmem:[%s2191_s28] ss:$0 sm:$0xff]  ;;  %v1906_v3 = vld [vmem:[%s2191_s28 + $0x1] ss:$0 sm:$0xff]  ;;  %s1726_s28 = smov [#allocation2]  }
  0x19   :  { %v80_v7 = vsub.f32 1.0, %v79_v6 }
  0x1a   :  { %172 = vmatpush.bf16.msra.mxu0 %v1555_v23 }
  0x1b   :  { %v81_v8 = vmul.f32 %v1630_v5, %v80_v7 }
  0x1d   :  { %v82_v9 = vadd.f32 %v1630_v5, %v81_v8 }
  0x1f   :  { %v1840_v10 = vsel %vm83_vm1, %v1630_v5, %v82_v9  ;;  %vm638_vm1 = vcmask 523264  }
  0x81   :  { %v74_v11 = vpop.xlane.xlu0 %73 }
  0x82   :  { %v85_v12 = vmul.f32 %v1840_v10, %v74_v11 }
  0x84   :  { %v87_v13 = vsub.f32 %v67_v0, %v85_v12 }
  0x86   :  { %v89_v14 = vmul.f32 %v87_v13, %v87_v13 }
  0x88   :  { %v91_v15 = vsel %vm71_vm0, %v89_v14, 0.0 }
  0x89   :  { %92 = vadd.xlane.f32.xlu1 %v91_v15  ;;  %v77_v16 = vpop.xlane.xlu0 %76 }
  0x8a   :  { %v86_v17 = vmul.f32 %v1840_v10, %v77_v16 }
  0x8c   :  { %v88_v18 = vsub.f32 %v68_v1, %v86_v17 }
  0x8e   :  { %v90_v19 = vmul.f32 %v88_v18, %v88_v18 }
  0x90   :  { %v94_v20 = vsel %vm71_vm0, %v90_v19, 0.0 }
  0x91   :  { %95 = vadd.xlane.f32.xlu1 %v94_v20 }
  0xfc   :  { %v93_v22 = vpop.xlane.xlu1 %92 }
  0xfd   :  { %v97_v24 = vmul.f32 %v93_v22, %v1840_v10 }
  0xff   :  { %v99_v25 = vadd.f32 1e-05, %v97_v24 }
 0x101   :  { %1631 = vrsqrt.f32 %v99_v25  ;;  %vm107_vm3 = vweird.f32 %v99_v25 }
 0x104   :  { %v96_v26 = vpop.xlane.xlu1 %95 }
 0x105   :  { %v98_v27 = vmul.f32 %v96_v26, %v1840_v10 }
 0x107   :  { %v1632_v28 = vpop.eup %1631  ;;  %v100_v29 = vadd.f32 1e-05, %v98_v27 }
 0x108   :  { %v102_v30 = vmul.f32 %v1632_v28, %v99_v25  ;;  %vm108_vm2 = vweird.f32 %v1632_v28 }
 0x109   :  { %1633 = vrsqrt.f32 %v100_v29  ;;  %vm109_vm4 = vmor %vm107_vm3, %vm108_vm2  ;;  %vm117_vm6 = vweird.f32 %v100_v29 }
 0x10a   :  { %v103_v31 = vmul.f32 %v1632_v28, %v102_v30 }
 0x10c   :  { %v104_v32 = vmul.f32 0.5, %v103_v31 }
 0x10e   :  { %v105_v33 = vsub.f32 1.5, %v104_v32 }
 0x10f   :  { %v1634_v34 = vpop.eup %1633 }
 0x110   :  { %v106_v35 = vmul.f32 %v1632_v28, %v105_v33  ;;  %v112_v36 = vmul.f32 %v1634_v34, %v100_v29  ;;  %vm118_vm5 = vweird.f32 %v1634_v34 }
 0x111   :  { %vm119_vm7 = vmor %vm117_vm6, %vm118_vm5 }
 0x112   :  { %v113_v37 = vmul.f32 %v1634_v34, %v112_v36  ;;  %v110_v38 = vsel %vm109_vm4, %v1632_v28, %v106_v35 }
 0x113   :  { %v121_v41 = vmul.f32 %v110_v38, %v87_v13 }
 0x114   :  { %v114_v39 = vmul.f32 0.5, %v113_v37 }
 0x115   :  { %v126_v46 = vmul.f32 %v1607_v42, %v121_v41 }
 0x116   :  { %v115_v40 = vsub.f32 1.5, %v114_v39 }
 0x117   :  { %v1860_v49 = vadd.f32 %v1608_v47, %v126_v46 }
 0x118   :  { %v116_v43 = vmul.f32 %v1634_v34, %v115_v40 }
 0x11a   :  { %v120_v44 = vsel %vm119_vm7, %v1634_v34, %v116_v43 }
 0x11b   :  { %v122_v45 = vmul.f32 %v120_v44, %v88_v18 }
 0x11d   :  { %v127_v48 = vmul.f32 %v1607_v42, %v122_v45 }
 0x11f   :  { %v1862_v50 = vadd.f32 %v1608_v47, %v127_v48 }
 0x121   :  { %v141_v51 = vpack.c.bf16 %v1862_v50, %v1860_v49 }
 0x123   :  { %1405 = vmatmul.msk.bf16.vlgmr.msra.gmra.mxu0 %vm71_vm0, %v141_v51 }
 0x1a0   :  { %v174_v53 = vpop.f32.mrf.mxu0 }
 0x1a1   :  { %v1870_v54 = vadd.f32 %v1609_v52, %v174_v53 }
 0x1a3   :  { %311 = vrot.lane.b32.xlu0 %v1870_v54, %s1720_s24  ;;  %180 = vrot.lane.b32.xlu2 %v1870_v54, %s1721_s2 }
 0x1a8   :  { %v176_v55 = vpop.f32.mrf.mxu0 }
 0x1a9   :  { %v1876_v56 = vadd.f32 %v1609_v52, %v176_v55 }
 0x1ab   :  { %339 = vrot.lane.b32.xlu1 %v1876_v56, %s1720_s24  ;;  %208 = vrot.lane.b32.xlu2 %v1876_v56, %s1721_s2  ;;  %v1587_v14 = vpack.i.bf16 %v1876_v56, %v1870_v54 }
 0x1b3   :  { %309 = vrot.lane.b32.xlu2 %v1870_v54, %s1722_s25 }
 0x1bb   :  { %337 = vrot.lane.b32.xlu2 %v1876_v56, %s1722_s25 }
 0x1fd   :  { %v181_v57 = vpop.permute.xlu2 %180 }
 0x1fe   :  { %1406 = vmatpush.xpose.msk.msrb.mxu0 %vm182_vm8, %v181_v57 }
 0x201   :  { %1407 = vmatmul.msk.f32.vlgmr.msrb.gmra.mxu0 %vm182_vm8, %v1870_v54 }
 0x205   :  { %v209_v58 = vpop.permute.xlu2 %208 }
 0x206   :  { %1408 = vmatpush.xpose.msk.msra.mxu2 %vm182_vm8, %v209_v58 }
 0x209   :  { %1409 = vmatmul.msk.f32.vlgmr.msra.gmra.mxu2 %vm182_vm8, %v1876_v56 }
 0x20d   :  { %v310_v60 = vpop.permute.xlu2 %309 }
 0x215   :  { %v312_v59 = vpop.permute.xlu0 %311  ;;  %v338_v62 = vpop.permute.xlu2 %337 }
 0x216   :  { %1412 = vmatpush.xpose.msk.msra.mxu1 %vm182_vm8, %v312_v59 }
 0x219   :  { %1413 = vmatmul.msk.f32.vlgmr.msra.gmra.mxu1 %vm182_vm8, %v310_v60  ;;  %v1557_v60 = vld [vmem:[%s2161_s6] sm:$0xff] }
 0x21d   :  { %v340_v61 = vpop.permute.xlu1 %339 }
 0x21e   :  { %1414 = vmatpush.xpose.msk.msrb.mxu2 %vm182_vm8, %v340_v61 }
 0x221   :  { %1415 = vmatmul.msk.f32.vlgmr.msrb.gmra.mxu2 %vm182_vm8, %v338_v62 }
 0x27e   :  { %v204_v0 = vpop.f32.mrf.mxu0 }
 0x27f   :  { %v205_v1 = vadd.f32 %v1899_v63, %v204_v0 }
 0x281   :  { %v235_v2 = vsel %vm234_vm9, %v205_v1, -inf }
 0x282   :  { %236 = vmax.xlane.f32.xlu2 %v235_v2 }
 0x28c   :  { %v231_v4 = vpop.f32.mrf.mxu2 }
 0x28d   :  { %v232_v5 = vadd.f32 %v1906_v3, %v231_v4 }
 0x28f   :  { %v238_v6 = vsel %vm234_vm9, %v232_v5, -inf }
 0x290   :  { %239 = vmax.xlane.f32.xlu0 %v238_v6 }
 0x296   :  { %v334_v7 = vpop.f32.mrf.mxu1 }
 0x297   :  { %v335_v8 = vadd.f32 %v1899_v63, %v334_v7 }
 0x299   :  { %v365_v9 = vsel %vm234_vm9, %v335_v8, -inf }
 0x29a   :  { %366 = vmax.xlane.f32.xlu1 %v365_v9 }
 0x2a4   :  { %v362_v11 = vpop.f32.mrf.mxu2 }
 0x2a5   :  { %v363_v12 = vadd.f32 %v1906_v3, %v362_v11 }
 0x2a7   :  { %v368_v13 = vsel %vm234_vm9, %v363_v12, -inf }
 0x2a8   :  { %369 = vmax.xlane.f32.xlu2 %v368_v13 }
 0x2b3   :  { %1588 = vrot.lane.b32.xlu1 %v1587_v14, %s1723_s30 }
 0x2f5   :  { %v237_v15 = vpop.xlane.xlu2 %236 }
 0x2f6   :  { %v241_v16 = vsub.f32 %v205_v1, %v237_v15 }
 0x2f8   :  { %v243_v17 = vmul.f32 1.442695, %v241_v16 }
 0x2fa   :  { %1635 = vpow2.f32 %v243_v17 }
 0x300   :  { %v1636_v18 = vpop.eup %1635 }
 0x301   :  { %v247_v19 = vsel %vm234_vm9, %v1636_v18, 0.0 }
 0x302   :  { %248 = vadd.xlane.f32.xlu0 %v247_v19 }
 0x303   :  { %v240_v20 = vpop.xlane.xlu0 %239 }
 0x304   :  { %v242_v21 = vsub.f32 %v232_v5, %v240_v20  ;;  %v1612_v5 = vld [vmem:[%s2162_s7] ss:$0 sm:$0xff] }
 0x306   :  { %v245_v22 = vmul.f32 1.442695, %v242_v21 }
 0x308   :  { %1637 = vpow2.f32 %v245_v22 }
 0x30d   :  { %v367_v23 = vpop.xlane.xlu1 %366 }
 0x30e   :  { %v1638_v24 = vpop.eup %1637  ;;  %v371_v25 = vsub.f32 %v335_v8, %v367_v23 }
 0x30f   :  { %v250_v26 = vsel %vm234_vm9, %v1638_v24, 0.0 }
 0x310   :  { %v373_v27 = vmul.f32 1.442695, %v371_v25  ;;  %251 = vadd.xlane.f32.xlu2 %v250_v26  ;;  %v1559_v26 = vld [vmem:[%s2165_s10] sm:$0xff] }
 0x312   :  { %1639 = vpow2.f32 %v373_v27 }
 0x318   :  { %v1640_v28 = vpop.eup %1639 }
 0x319   :  { %v377_v29 = vsel %vm234_vm9, %v1640_v28, 0.0 }
 0x31a   :  { %378 = vadd.xlane.f32.xlu0 %v377_v29 }
 0x31b   :  { %v370_v30 = vpop.xlane.xlu2 %369 }
 0x31c   :  { %v372_v31 = vsub.f32 %v363_v12, %v370_v30 }
 0x31e   :  { %v375_v32 = vmul.f32 1.442695, %v372_v31 }
 0x320   :  { %1641 = vpow2.f32 %v375_v32 }
 0x325   :  { %v1589_v33 = vpop.permute.xlu1 %1588 }
 0x326   :  { %v1642_v34 = vpop.eup %1641  ;;  %v1590_v35 = vunpack.i.l.bf16 %v1589_v33  ;;  %v1591_v36 = vunpack.i.h.bf16 %v1589_v33 }
 0x327   :  { %v380_v37 = vsel %vm234_vm9, %v1642_v34, 0.0 }
 0x328   :  { %278 = vmatpush.msra.mxu3 %v1590_v35  ;;  %381 = vadd.xlane.f32.xlu2 %v380_v37 }
 0x32a   :  { %304 = vmatpush.msrb.mxu3 %v1591_v36 }
 0x32e   :  { %387 = vrot.lane.b32.xlu0 %v1870_v54, %s2180_s0  ;;  %v1558_v54 = vld [vmem:[%s2161_s6 + $0x8] sm:$0xff] }
 0x32f   :  { %479 = vmatpush.bf16.msra.mxu2 %v1558_v54 }
 0x333   :  { %480 = vmatpush.bf16.msra.mxu2 %v1557_v60  ;;  %v1561_v60 = vld [vmem:[%s2167_s12] sm:$0xff] }
 0x340   :  { %413 = vrot.lane.b32.xlu2 %v1876_v56, %s2180_s0 }
 0x375   :  { %v249_v38 = vpop.xlane.xlu0 %248 }
 0x376   :  { %1643 = vrcp.f32 %v249_v38 }
 0x37c   :  { %v1644_v39 = vpop.eup %1643 }
 0x37d   :  { %v255_v40 = vmul.f32 %v1644_v39, %v1636_v18 }
 0x37f   :  { %1410 = vmatmul.msk.f32.vlgmr.msra.gmra.mxu3 %vm234_vm9, %v255_v40 }
 0x383   :  { %v252_v41 = vpop.xlane.xlu2 %251 }
 0x384   :  { %1645 = vrcp.f32 %v252_v41 }
 0x38a   :  { %v1646_v42 = vpop.eup %1645 }
 0x38b   :  { %v256_v43 = vmul.f32 %v1646_v42, %v1638_v24 }
 0x38d   :  { %1411 = vmatmul.msk.f32.vlgmr.msrb.gmra.mxu3 %vm234_vm9, %v256_v43  ;;  %v379_v44 = vpop.xlane.xlu0 %378  ;;  %v1613_v43 = vld [vmem:[%s2163_s8] ss:$0 sm:$0xff] }
 0x38e   :  { %1647 = vrcp.f32 %v379_v44 }
 0x394   :  { %v1648_v46 = vpop.eup %1647 }
 0x395   :  { %v385_v47 = vmul.f32 %v1648_v46, %v1640_v28 }
 0x39b   :  { %v382_v45 = vpop.xlane.xlu2 %381 }
 0x39c   :  { %1649 = vrcp.f32 %v382_v45 }
 0x3a0   :  { %v388_v48 = vpop.permute.xlu0 %387 }
 0x3a1   :  { %408 = vmatpush.msra.mxu3 %v388_v48 }
 0x3a2   :  { %v1650_v51 = vpop.eup %1649  ;;  %1416 = vmatmul.msk.f32.vlgmr.msra.gmra.mxu3 %vm234_vm9, %v385_v47  ;;  %v1614_v47 = vld [vmem:[%s2164_s9] ss:$0 sm:$0xff] }
 0x3a3   :  { %v414_v52 = vpop.permute.xlu2 %413  ;;  %v386_v53 = vmul.f32 %v1650_v51, %v1642_v34 }
 0x3a4   :  { %434 = vmatpush.msrb.mxu1 %v414_v52 }
 0x3a5   :  { %1417 = vmatmul.msk.f32.vlgmr.msrb.gmra.mxu1 %vm234_vm9, %v386_v53 }
 0x402   :  { %v280_v55 = vpop.f32.mrf.mxu3 }
 0x410   :  { %v306_v56 = vpop.f32.mrf.mxu3 }
 0x422   :  { %v436_v57 = vpop.f32.mrf.mxu1 }
 0x425   :  { %v410_v58 = vpop.f32.mrf.mxu3 }
 0x426   :  { %v1592_v59 = vpack.i.bf16 %v436_v57, %v410_v58  ;;  %v1563_v57 = vld [vmem:[%s2167_s12 + $0x10] sm:$0xff]  ;;  %v1562_v58 = vld [vmem:[%s2167_s12 + $0x8] sm:$0xff] }
 0x428   :  { %1593 = vrot.lane.b32.xlu1 %v1592_v59, %s2179_s22  ;;  %v1615_v59 = vld [vmem:[%s2166_s11] ss:$0 sm:$0xff] }
 0x49a   :  { %v1594_v61 = vpop.permute.xlu1 %1593 }
 0x49b   :  { %v1596_v62 = vunpack.i.h.bf16 %v1594_v61  ;;  %v1595_v0 = vunpack.i.l.bf16 %v1594_v61 }
 0x49d   :  { %v448_v1 = vsel %vm182_vm8, %v306_v56, %v1596_v62  ;;  %v447_v2 = vsel %vm182_vm8, %v280_v55, %v1595_v0  ;;  %v1564_v56 = vld [vmem:[%s2167_s12 + $0x18] sm:$0xff] }
 0x49e   :  { %v449_v4 = vpack.c.bf16 %v448_v1, %v447_v2 }
 0x4a0   :  { %1426 = vmatmul.msk.bf16.vlgmr.msra.gmra.mxu2 %vm71_vm0, %v449_v4 }
 0x523   :  { %v482_v6 = vpop.f32.mrf.mxu2 }
 0x524   :  { %v483_v7 = vadd.f32 %v1612_v5, %v482_v6 }
 0x526   :  { %v487_v8 = vadd.f32 %v483_v7, %v1860_v49 }
 0x528   :  { %v491_v9 = vsel %vm71_vm0, %v487_v8, 0.0 }
 0x529   :  { %492 = vadd.xlane.f32.xlu0 %v491_v9 }
 0x52b   :  { %v484_v11 = vpop.f32.mrf.mxu2 }
 0x52c   :  { %v485_v12 = vadd.f32 %v1612_v5, %v484_v11 }
 0x52e   :  { %v488_v13 = vadd.f32 %v485_v12, %v1862_v50  ;;  %v1560_v50 = vld [vmem:[%s2165_s10 + $0x8] sm:$0xff] }
 0x52f   :  { %575 = vmatpush.bf16.msrb.mxu3 %v1560_v50 }
 0x530   :  { %v494_v14 = vsel %vm71_vm0, %v488_v13, 0.0 }
 0x531   :  { %495 = vadd.xlane.f32.xlu1 %v494_v14 }
 0x533   :  { %576 = vmatpush.bf16.msrb.mxu3 %v1559_v26 }
 0x537   :  { %646 = vmatpush.bf16.msra.mxu3 %v1564_v56 }
 0x53b   :  { %647 = vmatpush.bf16.msra.mxu3 %v1563_v57 }
 0x53f   :  { %648 = vmatpush.bf16.msra.mxu3 %v1562_v58 }
 0x543   :  { %649 = vmatpush.bf16.msra.mxu3 %v1561_v60 }
 0x59c   :  { %v493_v15 = vpop.xlane.xlu0 %492 }
 0x59d   :  { %v497_v16 = vmul.f32 %v493_v15, %v1840_v10 }
 0x59f   :  { %v499_v17 = vsub.f32 %v487_v8, %v497_v16 }
 0x5a1   :  { %v501_v18 = vmul.f32 %v499_v17, %v499_v17 }
 0x5a3   :  { %v503_v19 = vsel %vm71_vm0, %v501_v18, 0.0 }
 0x5a4   :  { %v496_v20 = vpop.xlane.xlu1 %495  ;;  %504 = vadd.xlane.f32.xlu2 %v503_v19 }
 0x5a5   :  { %v498_v49 = vmul.f32 %v496_v20, %v1840_v10 }
 0x5a7   :  { %v500_v21 = vsub.f32 %v488_v13, %v498_v49 }
 0x5a9   :  { %v502_v22 = vmul.f32 %v500_v21, %v500_v21 }
 0x5ab   :  { %v506_v23 = vsel %vm71_vm0, %v502_v22, 0.0  ;;  %v1616_v22 = vld [vmem:[%s2168_s13] ss:$0 sm:$0xff] }
 0x5ac   :  { %507 = vadd.xlane.f32.xlu0 %v506_v23 }
 0x617   :  { %v505_v24 = vpop.xlane.xlu2 %504 }
 0x618   :  { %v509_v25 = vmul.f32 %v505_v24, %v1840_v10 }
 0x61a   :  { %v511_v27 = vadd.f32 1e-05, %v509_v25 }
 0x61c   :  { %1651 = vrsqrt.f32 %v511_v27  ;;  %vm519_vm11 = vweird.f32 %v511_v27 }
 0x61f   :  { %v508_v28 = vpop.xlane.xlu0 %507 }
 0x620   :  { %v510_v29 = vmul.f32 %v508_v28, %v1840_v10 }
 0x622   :  { %v1652_v30 = vpop.eup %1651  ;;  %v512_v31 = vadd.f32 1e-05, %v510_v29 }
 0x623   :  { %v514_v32 = vmul.f32 %v1652_v30, %v511_v27  ;;  %vm520_vm10 = vweird.f32 %v1652_v30 }
 0x624   :  { %1653 = vrsqrt.f32 %v512_v31  ;;  %vm521_vm12 = vmor %vm519_vm11, %vm520_vm10  ;;  %vm529_vm14 = vweird.f32 %v512_v31 }
 0x625   :  { %v515_v33 = vmul.f32 %v1652_v30, %v514_v32 }
 0x627   :  { %v516_v34 = vmul.f32 0.5, %v515_v33 }
 0x629   :  { %v517_v35 = vsub.f32 1.5, %v516_v34 }
 0x62a   :  { %v1654_v36 = vpop.eup %1653 }
 0x62b   :  { %v518_v37 = vmul.f32 %v1652_v30, %v517_v35  ;;  %v524_v38 = vmul.f32 %v1654_v36, %v512_v31  ;;  %vm530_vm13 = vweird.f32 %v1654_v36 }
 0x62c   :  { %vm531_vm15 = vmor %vm529_vm14, %vm530_vm13 }
 0x62d   :  { %v525_v39 = vmul.f32 %v1654_v36, %v524_v38  ;;  %v522_v40 = vsel %vm521_vm12, %v1652_v30, %v518_v37 }
 0x62e   :  { %v533_v44 = vmul.f32 %v522_v40, %v499_v17  ;;  %v1566_v40 = vld [vmem:[%s2188_s26 + $0x18] sm:$0xff] }
 0x62f   :  { %v526_v41 = vmul.f32 0.5, %v525_v39  ;;  %746 = vmatpush.bf16.msra.mxu1 %v1566_v40 }
 0x630   :  { %v538_v48 = vmul.f32 %v1613_v43, %v533_v44 }
 0x631   :  { %v527_v42 = vsub.f32 1.5, %v526_v41 }
 0x632   :  { %v543_v53 = vadd.f32 %v1614_v47, %v538_v48 }
 0x633   :  { %v528_v45 = vmul.f32 %v1654_v36, %v527_v42 }
 0x635   :  { %v532_v46 = vsel %vm531_vm15, %v1654_v36, %v528_v45 }
 0x636   :  { %v534_v51 = vmul.f32 %v532_v46, %v500_v21 }
 0x638   :  { %v539_v52 = vmul.f32 %v1613_v43, %v534_v51  ;;  %v1565_v43 = vld [vmem:[%s2188_s26 + $0x10] sm:$0xff] }
 0x639   :  { %747 = vmatpush.bf16.msra.mxu1 %v1565_v43 }
 0x63a   :  { %v544_v54 = vadd.f32 %v1614_v47, %v539_v52 }
 0x63c   :  { %v545_v55 = vpack.c.bf16 %v544_v54, %v543_v53 }
 0x63e   :  { %1435 = vmatmul.msk.bf16.vlgmr.msrb.gmra.mxu3 %vm71_vm0, %v545_v55 }
 0x6c1   :  { %v578_v61 = vpop.f32.mrf.mxu3 }
 0x6c2   :  { %v579_v62 = vadd.f32 %v1615_v59, %v578_v61 }
 0x6c4   :  { %v583_v0 = vmul.f32 %v579_v62, %v579_v62 }
 0x6c6   :  { %v585_v1 = vmul.f32 %v583_v0, %v579_v62 }
 0x6c8   :  { %v587_v2 = vmul.f32 0.044715, %v585_v1 }
 0x6c9   :  { %v580_v4 = vpop.f32.mrf.mxu3 }
 0x6ca   :  { %v589_v5 = vadd.f32 %v587_v2, %v579_v62  ;;  %v581_v6 = vadd.f32 %v1615_v59, %v580_v4  ;;  %v1618_v4 = vld [vmem:[%s2170_s15] ss:$0 sm:$0xff] }
 0x6cc   :  { %v591_v7 = vmul.f32 0.7978846, %v589_v5  ;;  %v584_v8 = vmul.f32 %v581_v6, %v581_v6 }
 0x6ce   :  { %v586_v9 = vmul.f32 %v584_v8, %v581_v6  ;;  %1655 = vtanh.f32 %v591_v7 }
 0x6d0   :  { %v588_v11 = vmul.f32 0.044715, %v586_v9 }
 0x6d2   :  { %v590_v12 = vadd.f32 %v588_v11, %v581_v6 }
 0x6d4   :  { %v592_v13 = vmul.f32 0.7978846, %v590_v12  ;;  %v1656_v14 = vpop.eup %1655  ;;  %v1619_v12 = vld [vmem:[%s2160_s5 + $0x1] ss:$0 sm:$0xff]  ;;  %s2192_s5 = smov 48  }
 0x6d5   :  { %v595_v15 = vadd.f32 1.0, %v1656_v14 }
 0x6d6   :  { %1657 = vtanh.f32 %v592_v13 }
 0x6d7   :  { %v597_v17 = vmul.f32 0.5, %v595_v15 }
 0x6d9   :  { %v599_v20 = vmul.f32 %v597_v17, %v579_v62  ;;  %v1617_v62 = vld [vmem:[%s2169_s14] ss:$0 sm:$0xff] }
 0x6dc   :  { %v1658_v16 = vpop.eup %1657 }
 0x6dd   :  { %v596_v18 = vadd.f32 1.0, %v1658_v16 }
 0x6df   :  { %v598_v19 = vmul.f32 0.5, %v596_v18 }
 0x6e1   :  { %v600_v49 = vmul.f32 %v598_v19, %v581_v6 }
 0x6e3   :  { %v601_v21 = vpack.c.bf16 %v600_v49, %v599_v20 }
 0x6e5   :  { %1452 = vmatmul.msk.bf16.vlgmr.msra.gmra.mxu3 %vm638_vm1, %v601_v21 }
 0x768   :  { %v651_v23 = vpop.f32.mrf.mxu3 }
 0x769   :  { %v652_v50 = vadd.f32 %v1616_v22, %v651_v23 }
 0x76b   :  { %v656_v24 = vadd.f32 %v652_v50, %v543_v53 }
 0x76d   :  { %v660_v25 = vsel %vm71_vm0, %v656_v24, 0.0 }
 0x76e   :  { %661 = vadd.xlane.f32.xlu1 %v660_v25 }
 0x770   :  { %v653_v26 = vpop.f32.mrf.mxu3 }
 0x771   :  { %v654_v27 = vadd.f32 %v1616_v22, %v653_v26 }
 0x773   :  { %v657_v28 = vadd.f32 %v654_v27, %v544_v54 }
 0x775   :  { %v663_v29 = vsel %vm71_vm0, %v657_v28, 0.0 }
 0x776   :  { %664 = vadd.xlane.f32.xlu2 %v663_v29 }
 0x7e1   :  { %v662_v30 = vpop.xlane.xlu1 %661 }
 0x7e2   :  { %v666_v31 = vmul.f32 %v662_v30, %v1840_v10 }
 0x7e4   :  { %v668_v32 = vsub.f32 %v656_v24, %v666_v31 }
 0x7e6   :  { %v670_v33 = vmul.f32 %v668_v32, %v668_v32 }
 0x7e8   :  { %v672_v34 = vsel %vm71_vm0, %v670_v33, 0.0 }
 0x7e9   :  { %v665_v35 = vpop.xlane.xlu2 %664  ;;  %673 = vadd.xlane.f32.xlu0 %v672_v34 }
 0x7ea   :  { %v667_v36 = vmul.f32 %v665_v35, %v1840_v10 }
 0x7ec   :  { %v669_v37 = vsub.f32 %v657_v28, %v667_v36 }
 0x7ee   :  { %v671_v38 = vmul.f32 %v669_v37, %v669_v37 }
 0x7f0   :  { %v675_v39 = vsel %vm71_vm0, %v671_v38, 0.0 }
 0x7f1   :  { %676 = vadd.xlane.f32.xlu1 %v675_v39 }
 0x85c   :  { %v674_v41 = vpop.xlane.xlu0 %673 }
 0x85d   :  { %v678_v42 = vmul.f32 %v674_v41, %v1840_v10 }
 0x85f   :  { %v680_v44 = vadd.f32 1e-05, %v678_v42 }
 0x861   :  { %1659 = vrsqrt.f32 %v680_v44  ;;  %vm688_vm3 = vweird.f32 %v680_v44 }
 0x864   :  { %v677_v45 = vpop.xlane.xlu1 %676 }
 0x865   :  { %v679_v46 = vmul.f32 %v677_v45, %v1840_v10 }
 0x867   :  { %v1660_v47 = vpop.eup %1659  ;;  %v681_v48 = vadd.f32 1e-05, %v679_v46 }
 0x868   :  { %v683_v51 = vmul.f32 %v1660_v47, %v680_v44  ;;  %vm689_vm2 = vweird.f32 %v1660_v47 }
 0x869   :  { %1661 = vrsqrt.f32 %v681_v48  ;;  %vm690_vm4 = vmor %vm688_vm3, %vm689_vm2  ;;  %vm698_vm6 = vweird.f32 %v681_v48 }
 0x86a   :  { %v684_v52 = vmul.f32 %v1660_v47, %v683_v51 }
 0x86c   :  { %v685_v53 = vmul.f32 0.5, %v684_v52 }
 0x86e   :  { %v686_v54 = vsub.f32 1.5, %v685_v53 }
 0x86f   :  { %v1662_v55 = vpop.eup %1661 }
 0x870   :  { %v687_v56 = vmul.f32 %v1660_v47, %v686_v54  ;;  %v693_v57 = vmul.f32 %v1662_v55, %v681_v48  ;;  %vm699_vm5 = vweird.f32 %v1662_v55 }
 0x871   :  { %vm700_vm7 = vmor %vm698_vm6, %vm699_vm5  ;;  %vm1311_vm5 = vcmask 1041409  }
 0x872   :  { %v694_v58 = vmul.f32 %v1662_v55, %v693_v57  ;;  %v691_v59 = vsel %vm690_vm4, %v1660_v47, %v687_v56 }
 0x873   :  { %v702_v0 = vmul.f32 %v691_v59, %v668_v32 }
 0x874   :  { %v695_v60 = vmul.f32 0.5, %v694_v58 }
 0x875   :  { %v707_v5 = vmul.f32 %v1617_v62, %v702_v0 }
 0x876   :  { %v696_v61 = vsub.f32 1.5, %v695_v60 }
 0x877   :  { %v2004_v8 = vadd.f32 %v1618_v4, %v707_v5 }
 0x878   :  { %v697_v1 = vmul.f32 %v1662_v55, %v696_v61 }
 0x87a   :  { %v701_v2 = vsel %vm700_vm7, %v1662_v55, %v697_v1 }
 0x87b   :  { %v703_v6 = vmul.f32 %v701_v2, %v669_v37 }
 0x87d   :  { %v708_v7 = vmul.f32 %v1617_v62, %v703_v6 }
 0x87f   :  { %v2006_v9 = vadd.f32 %v1618_v4, %v708_v7 }
 0x881   :  { %v714_v11 = vpack.c.bf16 %v2006_v9, %v2004_v8 }
 0x883   :  { %1466 = vmatmul.msk.bf16.vlgmr.msra.gmra.mxu1 %vm71_vm0, %v714_v11 }
 0x900   :  { %v749_v13 = vpop.f32.mrf.mxu1 }
 0x901   :  { %v2014_v14 = vadd.f32 %v1619_v12, %v749_v13 }
 0x903   :  { %755 = vrot.lane.b32.xlu2 %v2014_v14, %s1721_s2 }
 0x908   :  { %v751_v15 = vpop.f32.mrf.mxu1 }
 0x909   :  { %v2018_v16 = vadd.f32 %v1619_v12, %v751_v15  ;;  %v1568_v12 = vld [vmem:[%s2161_s6 + $0x18] sm:$0xff] }
 0x90b   :  { %912 = vrot.lane.b32.xlu1 %v2018_v16, %s1720_s24  ;;  %782 = vrot.lane.b32.xlu0 %v2018_v16, %s1721_s2  ;;  %v1597_v53 = vpack.i.bf16 %v2014_v14, %v2018_v16 }
 0x90c   :  { %884 = vrot.lane.b32.xlu2 %v2014_v14, %s1720_s24 }
 0x913   :  { %910 = vrot.lane.b32.xlu0 %v2018_v16, %s1722_s25  ;;  %882 = vrot.lane.b32.xlu1 %v2014_v14, %s1722_s25  ;;  %s2193_s25 = smov 16  }
 0x95d   :  { %v756_v17 = vpop.permute.xlu2 %755 }
 0x95e   :  { %1467 = vmatpush.xpose.msk.msrb.mxu2 %vm182_vm8, %v756_v17 }
 0x961   :  { %1468 = vmatmul.msk.f32.vlgmr.msrb.gmra.mxu2 %vm182_vm8, %v2014_v14 }
 0x966   :  { %v885_v20 = vpop.permute.xlu2 %884 }
 0x97d   :  { %v913_v18 = vpop.permute.xlu1 %912  ;;  %v783_v19 = vpop.permute.xlu0 %782 }
 0x97e   :  { %1469 = vmatpush.xpose.msk.msra.mxu0 %vm182_vm8, %v783_v19  ;;  %1475 = vmatpush.xpose.msk.msrb.mxu3 %vm182_vm8, %v913_v18  ;;  %v1567_v18 = vld [vmem:[%s2161_s6 + $0x10] sm:$0xff] }
 0x981   :  { %1470 = vmatmul.msk.f32.vlgmr.msra.gmra.mxu0 %vm182_vm8, %v2018_v16 }
 0x982   :  { %1473 = vmatpush.xpose.msk.msrb.mxu0 %vm182_vm8, %v885_v20 }
 0x985   :  { %v911_v49 = vpop.permute.xlu0 %910  ;;  %v883_v21 = vpop.permute.xlu1 %882 }
 0x986   :  { %1476 = vmatmul.msk.f32.vlgmr.msrb.gmra.mxu3 %vm182_vm8, %v911_v49  ;;  %1054 = vmatpush.bf16.msra.mxu0 %v1568_v12  ;;  %v1574_v12 = vld [vmem:[%s2167_s12 + $0x38] sm:$0xff] }
 0x989   :  { %1474 = vmatmul.msk.f32.vlgmr.msrb.gmra.mxu0 %vm182_vm8, %v883_v21 }
 0x98a   :  { %1055 = vmatpush.bf16.msra.mxu0 %v1567_v18 }
 0x9e4   :  { %v778_v22 = vpop.f32.mrf.mxu2 }
 0x9e5   :  { %v779_v23 = vadd.f32 %v1899_v63, %v778_v22 }
 0x9e7   :  { %v808_v50 = vsel %vm234_vm9, %v779_v23, -inf }
 0x9e8   :  { %809 = vmax.xlane.f32.xlu2 %v808_v50  ;;  %v1620_v50 = vld [vmem:[%s2162_s7 + $0x1] ss:$0 sm:$0xff] }
 0x9fe   :  { %v805_v24 = vpop.f32.mrf.mxu0 }
 0x9ff   :  { %v806_v25 = vadd.f32 %v1906_v3, %v805_v24 }
 0xa01   :  { %v811_v26 = vsel %vm234_vm9, %v806_v25, -inf }
 0xa02   :  { %812 = vmax.xlane.f32.xlu0 %v811_v26 }
 0xa06   :  { %v907_v27 = vpop.f32.mrf.mxu0 }
 0xa07   :  { %v908_v28 = vadd.f32 %v1899_v63, %v907_v27 }
 0xa09   :  { %v935_v29 = vpop.f32.mrf.mxu3  ;;  %v938_v30 = vsel %vm234_vm9, %v908_v28, -inf }
 0xa0a   :  { %v936_v31 = vadd.f32 %v1906_v3, %v935_v29  ;;  %939 = vmax.xlane.f32.xlu0 %v938_v30 }
 0xa0c   :  { %v941_v32 = vsel %vm234_vm9, %v936_v31, -inf }
 0xa0d   :  { %942 = vmax.xlane.f32.xlu1 %v941_v32 }
 0xa5b   :  { %v810_v33 = vpop.xlane.xlu2 %809 }
 0xa5c   :  { %v814_v34 = vsub.f32 %v779_v23, %v810_v33 }
 0xa5e   :  { %v816_v35 = vmul.f32 1.442695, %v814_v34 }
 0xa60   :  { %1663 = vpow2.f32 %v816_v35 }
 0xa66   :  { %v1664_v36 = vpop.eup %1663 }
 0xa67   :  { %v820_v37 = vsel %vm234_vm9, %v1664_v36, 0.0 }
 0xa68   :  { %821 = vadd.xlane.f32.xlu1 %v820_v37 }
 0xa75   :  { %v813_v38 = vpop.xlane.xlu0 %812 }
 0xa76   :  { %v815_v39 = vsub.f32 %v806_v25, %v813_v38 }
 0xa78   :  { %v818_v63 = vmul.f32 1.442695, %v815_v39 }
 0xa7a   :  { %1665 = vpow2.f32 %v818_v63 }
 0xa7d   :  { %v940_v40 = vpop.xlane.xlu0 %939 }
 0xa7e   :  { %v944_v41 = vsub.f32 %v908_v28, %v940_v40 }
 0xa80   :  { %v1666_v42 = vpop.eup %1665  ;;  %v946_v3 = vmul.f32 1.442695, %v944_v41  ;;  %v943_v43 = vpop.xlane.xlu1 %942 }
 0xa81   :  { %v945_v44 = vsub.f32 %v936_v31, %v943_v43  ;;  %v823_v45 = vsel %vm234_vm9, %v1666_v42, 0.0 }
 0xa82   :  { %1667 = vpow2.f32 %v946_v3  ;;  %824 = vadd.xlane.f32.xlu2 %v823_v45  ;;  %v1569_v3 = vld [vmem:[%s2165_s10 + $0x10] sm:$0xff] }
 0xa83   :  { %v948_v46 = vmul.f32 1.442695, %v945_v44 }
 0xa85   :  { %1669 = vpow2.f32 %v948_v46 }
 0xa88   :  { %v1668_v47 = vpop.eup %1667 }
 0xa89   :  { %v950_v48 = vsel %vm234_vm9, %v1668_v47, 0.0 }
 0xa8a   :  { %951 = vadd.xlane.f32.xlu1 %v950_v48 }
 0xa8b   :  { %v1670_v51 = vpop.eup %1669 }
 0xa8c   :  { %v953_v52 = vsel %vm234_vm9, %v1670_v51, 0.0 }
 0xa8d   :  { %954 = vadd.xlane.f32.xlu0 %v953_v52 }
 0xa9a   :  { %1598 = vrot.lane.b32.xlu2 %v1597_v53, %s1723_s30 }
 0xaa1   :  { %986 = vrot.lane.b32.xlu0 %v2018_v16, %s2192_s5 }
 0xaa3   :  { %960 = vrot.lane.b32.xlu1 %v2014_v14, %s2192_s5  ;;  %s1388_s5 = sshll.u32 %s2175_s20, 4  ;;  %s1389_s5 = int_to_ptr.hbm [resolvable:$true] %s1388_s5 }
 0xadb   :  { %v822_v54 = vpop.xlane.xlu1 %821 }
 0xadc   :  { %1671 = vrcp.f32 %v822_v54 }
 0xae2   :  { %v1672_v56 = vpop.eup %1671 }
 0xae3   :  { %v828_v61 = vmul.f32 %v1672_v56, %v1664_v36 }
 0xaf5   :  { %v825_v55 = vpop.xlane.xlu2 %824 }
 0xaf6   :  { %1673 = vrcp.f32 %v825_v55 }
 0xafc   :  { %v1674_v57 = vpop.eup %1673 }
 0xafd   :  { %v1599_v58 = vpop.permute.xlu2 %1598  ;;  %v829_v62 = vmul.f32 %v1674_v57, %v1666_v42  ;;  %v952_v1 = vpop.xlane.xlu1 %951 }
 0xafe   :  { %v1601_v59 = vunpack.i.h.bf16 %v1599_v58  ;;  %v1600_v60 = vunpack.i.l.bf16 %v1599_v58 }
 0xb00   :  { %851 = vmatpush.msrb.mxu1 %v1601_v59  ;;  %877 = vmatpush.msra.mxu2 %v1600_v60  ;;  %v955_v0 = vpop.xlane.xlu0 %954  ;;  %v1621_v60 = vld [vmem:[%s2163_s8 + $0x1] ss:$0 sm:$0xff]  ;;  %s1386_s8 = sshll.u32 %s1726_s28, 4  ;;  %s1387_s8 = int_to_ptr.vmem [resolvable:$true] %s1386_s8 }
 0xb01   :  { %1471 = vmatmul.msk.f32.vlgmr.msrb.gmra.mxu1 %vm234_vm9, %v828_v61  ;;  %1472 = vmatmul.msk.f32.vlgmr.msra.gmra.mxu2 %vm234_vm9, %v829_v62  ;;  %1675 = vrcp.f32 %v955_v0 }
 0xb02   :  { %1677 = vrcp.f32 %v952_v1  ;;  %v1622_v1 = vld [vmem:[%s2164_s9 + $0x1] ss:$0 sm:$0xff] }
 0xb07   :  { %v1676_v2 = vpop.eup %1675 }
 0xb08   :  { %v1678_v4 = vpop.eup %1677  ;;  %v959_v5 = vmul.f32 %v1676_v2, %v1670_v51 }
 0xb09   :  { %v958_v7 = vmul.f32 %v1678_v4, %v1668_v47 }
 0xb13   :  { %v987_v6 = vpop.permute.xlu0 %986 }
 0xb14   :  { %1007 = vmatpush.msrb.mxu2 %v987_v6 }
 0xb15   :  { %v961_v11 = vpop.permute.xlu1 %960  ;;  %1478 = vmatmul.msk.f32.vlgmr.msrb.gmra.mxu2 %vm234_vm9, %v959_v5 }
 0xb16   :  { %981 = vmatpush.msra.mxu1 %v961_v11 }
 0xb17   :  { %1477 = vmatmul.msk.f32.vlgmr.msra.gmra.mxu1 %vm234_vm9, %v958_v7 }
 0xb18   :  { %1226 = vmatpush.bf16.msrb.mxu1 %v1574_v12 }
 0xb7e   :  { %v853_v13 = vpop.f32.mrf.mxu1 }
 0xb84   :  { %v879_v14 = vpop.f32.mrf.mxu2 }
 0xb94   :  { %v983_v15 = vpop.f32.mrf.mxu1 }
 0xb98   :  { %v1009_v16 = vpop.f32.mrf.mxu2 }
 0xb99   :  { %v1602_v17 = vpack.i.bf16 %v1009_v16, %v983_v15  ;;  %v1623_v15 = vld [vmem:[%s2166_s11 + $0x1] ss:$0 sm:$0xff] }
 0xb9b   :  { %1603 = vrot.lane.b32.xlu2 %v1602_v17, %s2193_s25  ;;  %v1571_v17 = vld [vmem:[%s2167_s12 + $0x20] sm:$0xff] }
 0xbf5   :  { %v1604_v19 = vpop.permute.xlu2 %1603 }
 0xbf6   :  { %v1606_v20 = vunpack.i.h.bf16 %v1604_v19  ;;  %v1605_v49 = vunpack.i.l.bf16 %v1604_v19 }
 0xbf8   :  { %v1021_v21 = vsel %vm182_vm8, %v879_v14, %v1606_v20  ;;  %v1020_v22 = vsel %vm182_vm8, %v853_v13, %v1605_v49  ;;  %v1573_v13 = vld [vmem:[%s2167_s12 + $0x30] sm:$0xff]  ;;  %v1572_v14 = vld [vmem:[%s2167_s12 + $0x28] sm:$0xff] }
 0xbf9   :  { %v1022_v23 = vpack.c.bf16 %v1021_v21, %v1020_v22  ;;  %1227 = vmatpush.bf16.msrb.mxu1 %v1573_v13 }
 0xbfb   :  { %1492 = vmatmul.msk.bf16.vlgmr.msra.gmra.mxu0 %vm71_vm0, %v1022_v23 }
 0xbfd   :  { %1228 = vmatpush.bf16.msrb.mxu1 %v1572_v14  ;;  %v1625_v14 = vld [vmem:[%s2169_s14 + $0x1] ss:$0 sm:$0xff] }
 0xc01   :  { %1229 = vmatpush.bf16.msrb.mxu1 %v1571_v17 }
 0xc78   :  { %v1057_v24 = vpop.f32.mrf.mxu0 }
 0xc79   :  { %v1058_v25 = vadd.f32 %v1620_v50, %v1057_v24 }
 0xc7b   :  { %v1062_v26 = vadd.f32 %v1058_v25, %v2004_v8 }
 0xc7d   :  { %v1068_v27 = vsel %vm71_vm0, %v1062_v26, 0.0 }
 0xc7e   :  { %1069 = vadd.xlane.f32.xlu0 %v1068_v27 }
 0xc80   :  { %v1059_v28 = vpop.f32.mrf.mxu0 }
 0xc81   :  { %v1060_v29 = vadd.f32 %v1620_v50, %v1059_v28 }
 0xc83   :  { %v1063_v30 = vadd.f32 %v1060_v29, %v2006_v9  ;;  %v1570_v9 = vld [vmem:[%s2165_s10 + $0x18] sm:$0xff] }
 0xc84   :  { %1154 = vmatpush.bf16.msra.mxu3 %v1570_v9 }
 0xc85   :  { %v1071_v31 = vsel %vm71_vm0, %v1063_v30, 0.0 }
 0xc86   :  { %1072 = vadd.xlane.f32.xlu2 %v1071_v31 }
 0xc88   :  { %1155 = vmatpush.bf16.msra.mxu3 %v1569_v3 }
 0xcf1   :  { %v1070_v32 = vpop.xlane.xlu0 %1069 }
 0xcf2   :  { %v1074_v33 = vmul.f32 %v1070_v32, %v1840_v10 }
 0xcf4   :  { %v1076_v34 = vsub.f32 %v1062_v26, %v1074_v33 }
 0xcf6   :  { %v1078_v35 = vmul.f32 %v1076_v34, %v1076_v34 }
 0xcf8   :  { %v1080_v36 = vsel %vm71_vm0, %v1078_v35, 0.0 }
 0xcf9   :  { %v1073_v37 = vpop.xlane.xlu2 %1072  ;;  %1081 = vadd.xlane.f32.xlu1 %v1080_v36 }
 0xcfa   :  { %v1075_v8 = vmul.f32 %v1073_v37, %v1840_v10 }
 0xcfc   :  { %v1077_v38 = vsub.f32 %v1063_v30, %v1075_v8  ;;  %v1624_v8 = vld [vmem:[%s2168_s13 + $0x1] ss:$0 sm:$0xff] }
 0xcfe   :  { %v1079_v39 = vmul.f32 %v1077_v38, %v1077_v38 }
 0xd00   :  { %v1083_v63 = vsel %vm71_vm0, %v1079_v39, 0.0 }
 0xd01   :  { %1084 = vadd.xlane.f32.xlu0 %v1083_v63 }
 0xd6c   :  { %v1082_v40 = vpop.xlane.xlu1 %1081 }
 0xd6d   :  { %v1086_v41 = vmul.f32 %v1082_v40, %v1840_v10 }
 0xd6f   :  { %v1088_v42 = vadd.f32 1e-05, %v1086_v41 }
 0xd71   :  { %1679 = vrsqrt.f32 %v1088_v42  ;;  %vm1096_vm9 = vweird.f32 %v1088_v42 }
 0xd74   :  { %v1085_v43 = vpop.xlane.xlu0 %1084 }
 0xd75   :  { %v1087_v44 = vmul.f32 %v1085_v43, %v1840_v10 }
 0xd77   :  { %v1680_v45 = vpop.eup %1679  ;;  %v1089_v46 = vadd.f32 1e-05, %v1087_v44 }
 0xd78   :  { %v1091_v47 = vmul.f32 %v1680_v45, %v1088_v42  ;;  %vm1097_vm8 = vweird.f32 %v1680_v45 }
 0xd79   :  { %1681 = vrsqrt.f32 %v1089_v46  ;;  %vm1098_vm10 = vmor %vm1096_vm9, %vm1097_vm8  ;;  %vm1106_vm12 = vweird.f32 %v1089_v46 }
 0xd7a   :  { %v1092_v48 = vmul.f32 %v1680_v45, %v1091_v47 }
 0xd7c   :  { %v1093_v51 = vmul.f32 0.5, %v1092_v48 }
 0xd7e   :  { %v1094_v52 = vsub.f32 1.5, %v1093_v51 }
 0xd7f   :  { %v1682_v53 = vpop.eup %1681 }
 0xd80   :  { %v1095_v54 = vmul.f32 %v1680_v45, %v1094_v52  ;;  %v1101_v55 = vmul.f32 %v1682_v53, %v1089_v46  ;;  %vm1107_vm11 = vweird.f32 %v1682_v53 }
 0xd81   :  { %vm1108_vm13 = vmor %vm1106_vm12, %vm1107_vm11 }
 0xd82   :  { %v1102_v56 = vmul.f32 %v1682_v53, %v1101_v55  ;;  %v1099_v57 = vsel %vm1098_vm10, %v1680_v45, %v1095_v54 }
 0xd83   :  { %v1110_v61 = vmul.f32 %v1099_v57, %v1076_v34 }
 0xd84   :  { %v1103_v58 = vmul.f32 0.5, %v1102_v56 }
 0xd85   :  { %v1115_v2 = vmul.f32 %v1621_v60, %v1110_v61  ;;  %v1575_v61 = vld [vmem:[%s2171_s16] sm:$0xff] }
 0xd86   :  { %v1104_v59 = vsub.f32 1.5, %v1103_v58  ;;  %v1576_v58 = vld [vmem:[%s2171_s16 + $0x8] sm:$0xff] }
 0xd87   :  { %v1120_v6 = vadd.f32 %v1622_v1, %v1115_v2  ;;  %1335 = vmatpush.bf16.msra.mxu2 %v1576_v58 }
 0xd88   :  { %v1105_v62 = vmul.f32 %v1682_v53, %v1104_v59 }
 0xd8a   :  { %v1109_v0 = vsel %vm1108_vm13, %v1682_v53, %v1105_v62 }
 0xd8b   :  { %v1111_v4 = vmul.f32 %v1109_v0, %v1077_v38  ;;  %1336 = vmatpush.bf16.msra.mxu2 %v1575_v61 }
 0xd8d   :  { %v1116_v5 = vmul.f32 %v1621_v60, %v1111_v4 }
 0xd8f   :  { %v1121_v7 = vadd.f32 %v1622_v1, %v1116_v5 }
 0xd91   :  { %v1122_v11 = vpack.c.bf16 %v1121_v7, %v1120_v6 }
 0xd93   :  { %1508 = vmatmul.msk.bf16.vlgmr.msra.gmra.mxu3 %vm71_vm0, %v1122_v11 }
 0xe16   :  { %v1157_v16 = vpop.f32.mrf.mxu3 }
 0xe17   :  { %v1158_v18 = vadd.f32 %v1623_v15, %v1157_v16 }
 0xe19   :  { %v1162_v19 = vmul.f32 %v1158_v18, %v1158_v18 }
 0xe1b   :  { %v1164_v20 = vmul.f32 %v1162_v19, %v1158_v18 }
 0xe1d   :  { %v1166_v49 = vmul.f32 0.044715, %v1164_v20 }
 0xe1e   :  { %v1159_v21 = vpop.f32.mrf.mxu3 }
 0xe1f   :  { %v1168_v22 = vadd.f32 %v1166_v49, %v1158_v18  ;;  %v1160_v23 = vadd.f32 %v1623_v15, %v1159_v21 }
 0xe21   :  { %v1170_v50 = vmul.f32 0.7978846, %v1168_v22  ;;  %v1163_v24 = vmul.f32 %v1160_v23, %v1160_v23 }
 0xe23   :  { %v1165_v25 = vmul.f32 %v1163_v24, %v1160_v23  ;;  %1683 = vtanh.f32 %v1170_v50 }
 0xe25   :  { %v1167_v26 = vmul.f32 0.044715, %v1165_v25 }
 0xe27   :  { %v1169_v27 = vadd.f32 %v1167_v26, %v1160_v23 }
 0xe29   :  { %v1171_v28 = vmul.f32 0.7978846, %v1169_v27  ;;  %v1684_v29 = vpop.eup %1683 }
 0xe2a   :  { %v1174_v30 = vadd.f32 1.0, %v1684_v29 }
 0xe2b   :  { %1685 = vtanh.f32 %v1171_v28 }
 0xe2c   :  { %v1176_v32 = vmul.f32 0.5, %v1174_v30  ;;  %v1578_v30 = vld [vmem:[%s2173_s18 + $0x8] sm:$0xff] }
 0xe2d   :  { %1373 = vmatpush.bf16.msrb.mxu0 %v1578_v30 }
 0xe2e   :  { %v1178_v35 = vmul.f32 %v1176_v32, %v1158_v18  ;;  %v1626_v18 = vld [vmem:[%s2170_s15 + $0x1] ss:$0 sm:$0xff]  ;;  %v1627_v32 = vld [vmem:[%s2172_s17] ss:$0 sm:$0xff] }
 0xe31   :  { %v1686_v31 = vpop.eup %1685 }
 0xe32   :  { %v1175_v33 = vadd.f32 1.0, %v1686_v31  ;;  %v1577_v31 = vld [vmem:[%s2173_s18] sm:$0xff] }
 0xe33   :  { %1374 = vmatpush.bf16.msrb.mxu0 %v1577_v31 }
 0xe34   :  { %v1177_v34 = vmul.f32 0.5, %v1175_v33 }
 0xe36   :  { %v1179_v36 = vmul.f32 %v1177_v34, %v1160_v23 }
 0xe38   :  { %v1180_v37 = vpack.c.bf16 %v1179_v36, %v1178_v35 }
 0xe3a   :  { %1534 = vmatmul.msk.bf16.vlgmr.msrb.gmra.mxu1 %vm638_vm1, %v1180_v37 }
 0xeb7   :  { %v1231_v38 = vpop.f32.mrf.mxu1 }
 0xeb8   :  { %v1232_v39 = vadd.f32 %v1624_v8, %v1231_v38 }
 0xeba   :  { %v1236_v63 = vadd.f32 %v1232_v39, %v1120_v6 }
 0xebc   :  { %v1242_v9 = vsel %vm71_vm0, %v1236_v63, 0.0 }
 0xebd   :  { %1243 = vadd.xlane.f32.xlu0 %v1242_v9 }
 0xebf   :  { %v1233_v40 = vpop.f32.mrf.mxu1 }
 0xec0   :  { %v1234_v41 = vadd.f32 %v1624_v8, %v1233_v40  ;;  %v1628_v8 = vld [vmem:[%s2174_s19] ss:$0 sm:$0xff] }
 0xec2   :  { %v1237_v42 = vadd.f32 %v1234_v41, %v1121_v7 }
 0xec4   :  { %v1245_v3 = vsel %vm71_vm0, %v1237_v42, 0.0 }
 0xec5   :  { %1246 = vadd.xlane.f32.xlu2 %v1245_v3 }
 0xf30   :  { %v1244_v43 = vpop.xlane.xlu0 %1243 }
 0xf31   :  { %v1248_v44 = vmul.f32 %v1244_v43, %v1840_v10 }
 0xf33   :  { %v1250_v45 = vsub.f32 %v1236_v63, %v1248_v44 }
 0xf35   :  { %v1252_v46 = vmul.f32 %v1250_v45, %v1250_v45 }
 0xf37   :  { %v1254_v47 = vsel %vm71_vm0, %v1252_v46, 0.0 }
 0xf38   :  { %v1247_v48 = vpop.xlane.xlu2 %1246  ;;  %1255 = vadd.xlane.f32.xlu2 %v1254_v47 }
 0xf39   :  { %v1249_v51 = vmul.f32 %v1247_v48, %v1840_v10 }
 0xf3b   :  { %v1251_v52 = vsub.f32 %v1237_v42, %v1249_v51 }
 0xf3d   :  { %v1253_v53 = vmul.f32 %v1251_v52, %v1251_v52 }
 0xf3f   :  { %v1257_v54 = vsel %vm71_vm0, %v1253_v53, 0.0 }
 0xf40   :  { %1258 = vadd.xlane.f32.xlu1 %v1257_v54 }
 0xfab   :  { %v1256_v55 = vpop.xlane.xlu2 %1255 }
 0xfac   :  { %v1260_v56 = vmul.f32 %v1256_v55, %v1840_v10 }
 0xfae   :  { %v1262_v57 = vadd.f32 1e-05, %v1260_v56 }
 0xfb0   :  { %1687 = vrsqrt.f32 %v1262_v57  ;;  %vm1270_vm15 = vweird.f32 %v1262_v57 }
 0xfb3   :  { %v1259_v59 = vpop.xlane.xlu1 %1258 }
 0xfb4   :  { %v1261_v60 = vmul.f32 %v1259_v59, %v1840_v10 }
 0xfb6   :  { %v1688_v62 = vpop.eup %1687  ;;  %v1263_v0 = vadd.f32 1e-05, %v1261_v60 }
 0xfb7   :  { %v1265_v1 = vmul.f32 %v1688_v62, %v1262_v57  ;;  %vm1271_vm14 = vweird.f32 %v1688_v62 }
 0xfb8   :  { %1689 = vrsqrt.f32 %v1263_v0  ;;  %vm1272_vm1 = vmor %vm1270_vm15, %vm1271_vm14  ;;  %vm1280_vm3 = vweird.f32 %v1263_v0 }
 0xfb9   :  { %v1266_v2 = vmul.f32 %v1688_v62, %v1265_v1 }
 0xfbb   :  { %v1267_v4 = vmul.f32 0.5, %v1266_v2 }
 0xfbd   :  { %v1268_v5 = vsub.f32 1.5, %v1267_v4 }
 0xfbe   :  { %v1690_v6 = vpop.eup %1689 }
 0xfbf   :  { %v1269_v7 = vmul.f32 %v1688_v62, %v1268_v5  ;;  %v1275_v11 = vmul.f32 %v1690_v6, %v1263_v0  ;;  %vm1281_vm2 = vweird.f32 %v1690_v6 }
 0xfc0   :  { %vm1282_vm4 = vmor %vm1280_vm3, %vm1281_vm2 }
 0xfc1   :  { %v1273_v12 = vsel %vm1272_vm1, %v1688_v62, %v1269_v7  ;;  %v1276_v10 = vmul.f32 %v1690_v6, %v1275_v11 }
 0xfc2   :  { %v1284_v15 = vmul.f32 %v1273_v12, %v1250_v45 }
 0xfc3   :  { %v1277_v13 = vmul.f32 0.5, %v1276_v10 }
 0xfc4   :  { %v1289_v19 = vmul.f32 %v1625_v14, %v1284_v15 }
 0xfc5   :  { %v1278_v16 = vsub.f32 1.5, %v1277_v13 }
 0xfc6   :  { %v1294_v21 = vadd.f32 %v1626_v18, %v1289_v19 }
 0xfc7   :  { %v1279_v17 = vmul.f32 %v1690_v6, %v1278_v16 }
 0xfc8   :  { %v1296_v50 = vpack.c.bf16 %v1294_v21, %v1294_v21 }
 0xfc9   :  { %v1283_v20 = vsel %vm1282_vm4, %v1690_v6, %v1279_v17 }
 0xfca   :  { %v1285_v49 = vmul.f32 %v1283_v20, %v1251_v52  ;;  %v1308_v26 = vunpack.c.l.b16 %v1296_v50 }
 0xfcc   :  { %v1290_v22 = vmul.f32 %v1625_v14, %v1285_v49 }
 0xfce   :  { %v1295_v23 = vadd.f32 %v1626_v18, %v1290_v22 }
 0xfd0   :  { %v1297_v24 = vpack.c.bf16 %v1295_v23, %v1295_v23 }
 0xfd2   :  { %v1309_v25 = vunpack.c.l.b16 %v1297_v24 }
 0xfd4   :  { %v1310_v27 = vrot.slane %v1309_v25, 7 }
 0xfd6   :  { %v1312_v28 = vsel %vm1311_vm5, %v1310_v27, %v1308_v26 }
 0xfd7   :  { %v1313_v29 = vpack.c.b16 %v1312_v28, %v1312_v28 }
 0xfd9   :  { %1545 = vmatmul.msk.bf16.vlgmr.msra.gmra.mxu2 %vm71_vm0, %v1313_v29 }
0x105c   :  { %v1338_v33 = vpop.f32.mrf.mxu2 }
0x105d   :  { %v1339_v34 = vadd.f32 %v1627_v32, %v1338_v33 }
0x105f   :  { %1691 = vtanh.f32 %v1339_v34 }
0x1064   :  { %v1340_v35 = vpop.f32.mrf.mxu2 }
0x1065   :  { %v1692_v36 = vpop.eup %1691 }
0x1066   :  { %v1343_v37 = vpack.c.bf16 %v1692_v36, %v1692_v36 }
0x1068   :  { %1554 = vmatmul.msk.bf16.vlgmr.msrb.gmra.mxu0 %vm71_vm0, %v1343_v37 }
0x10e5   :  { %v1376_v38 = vpop.f32.mrf.mxu0 }
0x10e6   :  { %v1377_v39 = vadd.f32 %v1628_v8, %v1376_v38 }
0x10e8   :  { %1380 = vst [vmem:[#allocation2] sm:$0x3] %v1377_v39 }
0x10e9   :  { %1391 = dma.vmem_to_hbm [thread:$0]  %s1387_s8, 32, %s1389_s5, [#allocation3]  }
0x10ed   :  { %v1378_v63 = vpop.f32.mrf.mxu0 }
0x10ee   :  { %1717 = dma.done.wait [#allocation3], 32  }
0x10ef   :  { %1718 = vsyncadd [#allocation3], 4294967264 }
0x10f0   :  { %1396 = vsyncpa [#allocation3], 1 }

</bundles_post_ra>
